<compile_context>
chip_gen: v7x
topology: tpu7x:2x2x1
jax: 0.10.0
libtpu: 0.0.40
codegen_flags: <defaults>
</compile_context>

<pallas_src>
import numpy as np
import jax
import jax.numpy as jnp
from jax.experimental import pallas as pl
from jax.experimental.pallas import tpu as pltpu


def _round_up(v, m):
    return -(-v // m) * m


def _dft_matrices(size, pad, dtype):
    """Ortho forward DFT of `size`, zero-embedded in a (pad, pad) tile, plus the
    Gauss / conjugate helper matrices: (re, im, re+im, -im, re-im).

    The ortho inverse DFT matrix is the conjugate of the forward one, so the
    inverse transform only needs (re, -im, re-im) from the same set.
    """
    idx = np.arange(size)
    ang = 2.0 * np.pi * np.outer(idx, idx) / size
    m = np.exp(-1j * ang) / np.sqrt(size)          # norm='ortho'
    r = np.zeros((pad, pad), np.float32)
    i = np.zeros((pad, pad), np.float32)
    r[:size, :size] = m.real
    i[:size, :size] = m.imag
    return tuple(jnp.asarray(a, dtype) for a in (r, i, r + i, -i, r - i))


def _vmem_capacity_bytes():
    """Physical VMEM per core: 128 MiB on v5e/v6e, 64 MiB on v7x."""
    try:
        return int(pltpu.get_tpu_info().vmem_capacity_bytes)
    except Exception:
        return 64 * 2**20        # conservative (v7x-sized) fallback


def _pick_batch_tile(n, per_item_bytes, fixed_bytes, vmem_cap, cap=8):
    """Largest divisor of n (<= cap) whose working set fits ~72% of this chip's
    VMEM, preferring a grid of length >= 2 (ideally even) so the "parallel"
    batch axis keeps both v7x TensorCores busy."""
    budget = int(vmem_cap * 0.72)
    max_b = max(1, (budget - fixed_bytes) // max(per_item_bytes, 1))
    cands = [b for b in range(1, int(min(cap, n, max_b)) + 1) if n % b == 0]
    if not cands:
        cands = [1]

    def score(b):
        g = n // b
        return (g >= 2 and g % 2 == 0, g >= 2 or n == 1, b)

    return max(cands, key=score)


def _make_dc_kernel(B, square):
    """Build the kernel body.  `square`=True means F_y aliases F_x (nx==ny)."""

    def kernel(x_ref, k0_ref, *refs):
        if square:
            (fxr_ref, fxi_ref, fxs_ref, fxn_ref, fxd_ref, o_ref) = refs
        else:
            (fxr_ref, fxi_ref, fxs_ref, fxn_ref, fxd_ref,
             fyr_ref, fyi_ref, fys_ref, fyn_ref, fyd_ref, o_ref) = refs

        # Constant DFT tiles: constant index_map -> DMA'd into VMEM once and
        # resident across the whole grid.
        fxr, fxi, fxs, fxn, fxd = (fxr_ref[...], fxi_ref[...], fxs_ref[...],
                                   fxn_ref[...], fxd_ref[...])
        if square:
            fyr, fyi, fys, fyn, fyd = fxr, fxi, fxs, fxn, fxd
        else:
            fyr, fyi, fys, fyn, fyd = (fyr_ref[...], fyi_ref[...], fys_ref[...],
                                       fyn_ref[...], fyd_ref[...])
        mxu_dtype = fxr.dtype

        def cgauss(ar, ai, a_sum, br, bi, b_sum):
            """(ar + i*ai) @ (br + i*bi) via Gauss's 3-multiplication form."""
            p1 = jnp.dot(ar, br, preferred_element_type=jnp.float32)
            p2 = jnp.dot(ai, bi, preferred_element_type=jnp.float32)
            p3 = jnp.dot(a_sum, b_sum, preferred_element_type=jnp.float32)
            return p1 - p2, p3 - p1 - p2

        def to_mxu(vr, vi):
            # Cast data operands for the bf16 MXU path (no-op when mxu_dtype=f32);
            # the Gauss helper sum is formed in f32 before the cast.
            return (vr.astype(mxu_dtype), vi.astype(mxu_dtype),
                    (vr + vi).astype(mxu_dtype))

        def body(b, carry):
            xr = x_ref[b, 0]            # (nx_pad, ny_pad) f32; also the DC mask
            xi = x_ref[b, 1]

            # FFT column transform: T = X @ F_y
            xr_m, xi_m, xs_m = to_mxu(xr, xi)
            tr, ti = cgauss(xr_m, xi_m, xs_m, fyr, fyi, fys)

            # FFT row transform: K = F_x @ T
            tr_m, ti_m, ts_m = to_mxu(tr, ti)
            kr, ki = cgauss(fxr, fxi, fxs, tr_m, ti_m, ts_m)

            # Data consistency (noise_lvl=None), f32 VPU math:
            #   out = (1 - m) * k + m * k0   with m := complex(x)
            # (the reference module builds the mask from x, not from `mask`).
            k0r = k0_ref[b, 0]
            k0i = k0_ref[b, 1]
            omr = 1.0 - xr
            omi = -xi
            outr = omr * kr - omi * ki + (xr * k0r - xi * k0i)
            outi = omr * ki + omi * kr + (xr * k0i + xi * k0r)

            # IFFT row transform: U = conj(F_x) @ out
            or_m, oi_m, os_m = to_mxu(outr, outi)
            ur, ui = cgauss(fxr, fxn, fxd, or_m, oi_m, os_m)

            # IFFT column transform, written straight to the output block
            # (no staging scratch, no slab round-trip): RES = U @ conj(F_y)
            ur_m, ui_m, us_m = to_mxu(ur, ui)
            rr, ri = cgauss(ur_m, ui_m, us_m, fyr, fyn, fyd)
            o_ref[b, 0] = rr.astype(o_ref.dtype)
            o_ref[b, 1] = ri.astype(o_ref.dtype)
            return carry

        # fori_loop(unroll=True) bounds the live set per plane while keeping
        # LLO scheduler visibility (vs. a fully unrolled Python loop).
        jax.lax.fori_loop(0, B, body, 0, unroll=True)

    return kernel


def data_consistency_in_kspace(x, k0, mask=None, noise_lvl=None, norm='ortho',
                               batch_tile=None, mxu_dtype=jnp.bfloat16):
    """x, k0, mask: (n, 2, nx, ny) float32. Returns (n, 2, nx, ny) float32.

    mxu_dtype selects the MXU operand dtype (accumulation is always f32).
    bf16 (default) is ~3-4x faster on the MXU; pass jnp.float32 for a
    full-precision path.
    """
    # TODO(synk): noise_lvl != None branch of data_consistency not implemented
    # (the module's default is noise_lvl=None).
    assert noise_lvl is None
    assert norm == 'ortho'
    n, two, nx, ny = x.shape
    assert two == 2
    # `mask` intentionally unused: the reference module builds mask_complex from x.
    del mask

    # Zero-pad so the lane dim is a multiple of 128 and the sublane dim a multiple
    # of 8 -> dense (unmasked) loads/stores and MXU tiles.  Zero-embedded DFT
    # matrices keep the result exact; padded output region is zero and sliced off.
    nx_pad = _round_up(nx, 8)
    ny_pad = _round_up(ny, 128)
    if (nx_pad, ny_pad) != (nx, ny):
        pad = ((0, 0), (0, 0), (0, nx_pad - nx), (0, ny_pad - ny))
        xp = jnp.pad(x, pad)
        k0p = jnp.pad(k0, pad)
    else:
        xp, k0p = x, k0

    itemsize = np.dtype(mxu_dtype).itemsize
    square = (nx == ny) and (nx_pad == ny_pad)

    # Rough per-step VMEM accounting (lane-padded, f32 except constants).
    const_bytes = 2 * itemsize * (5 * nx_pad * nx_pad
                                  + (0 if square else 5 * ny_pad * ny_pad))
    temp_bytes = 24 * nx_pad * ny_pad * 4          # per-plane live temporaries
    per_item = 3 * 2 * 2 * nx_pad * ny_pad * 4     # x, k0, out blocks, double-buffered
    vmem_cap = _vmem_capacity_bytes()

    B = (batch_tile if batch_tile is not None
         else _pick_batch_tile(n, per_item, const_bytes + temp_bytes, vmem_cap))
    assert n % B == 0, "batch_tile must divide n"

    fx_mats = _dft_matrices(nx, nx_pad, mxu_dtype)
    fy_mats = () if square else _dft_matrices(ny, ny_pad, mxu_dtype)

    img_spec = pl.BlockSpec((B, 2, nx_pad, ny_pad), lambda i: (i, 0, 0, 0))
    fx_spec = pl.BlockSpec((nx_pad, nx_pad), lambda i: (0, 0))
    fy_spec = pl.BlockSpec((ny_pad, ny_pad), lambda i: (0, 0))
    const_specs = [fx_spec] * 5 + ([] if square else [fy_spec] * 5)

    # Generation-aware scoped VMEM limit: never below the estimated need, never
    # above the chip's physical VMEM.
    est = B * per_item + const_bytes + temp_bytes
    vmem_limit = int(min(max(est + est // 2, 32 * 2**20), vmem_cap))
    vmem_limit = max(vmem_limit, min(est, vmem_cap))

    flops = 16 * n * nx_pad * ny_pad * (nx_pad + ny_pad)
    bytes_accessed = 3 * n * 2 * nx_pad * ny_pad * 4

    out = pl.pallas_call(
        _make_dc_kernel(B, square),
        out_shape=jax.ShapeDtypeStruct((n, 2, nx_pad, ny_pad), jnp.float32),
        grid_spec=pltpu.PrefetchScalarGridSpec(
            num_scalar_prefetch=0,
            grid=(n // B,),
            in_specs=[img_spec, img_spec] + const_specs,
            out_specs=img_spec,
        ),
        compiler_params=pltpu.CompilerParams(
            dimension_semantics=("parallel",),
            vmem_limit_bytes=vmem_limit),
        cost_estimate=pl.CostEstimate(flops=flops, transcendentals=0,
                                      bytes_accessed=bytes_accessed),
    )(xp, k0p, *fx_mats, *fy_mats)

    if (nx_pad, ny_pad) != (nx, ny):
        out = out[:, :, :nx, :ny]
    return out


def _reference(x, k0, mask):
    """Plain-JAX replica of the PyTorch forward (noise_lvl=None, norm='ortho')."""
    xc = x[:, 0] + 1j * x[:, 1]
    k0c = k0[:, 0] + 1j * k0[:, 1]
    k = jnp.fft.fft2(xc, norm='ortho')
    maskc = xc  # reproduces `mask_complex = view_as_complex(x)` in the original
    out = (1 - maskc) * k + maskc * k0c
    res = jnp.fft.ifft2(out, norm='ortho')
    return jnp.stack([jnp.real(res), jnp.imag(res)], axis=1).astype(jnp.float32)


if __name__ == "__main__":
    key = jax.random.PRNGKey(0)
    kx, kk, km = jax.random.split(key, 3)
    n, nx, ny = 2, 16, 16
    x = jax.random.normal(kx, (n, 2, nx, ny), dtype=jnp.float32)
    k0 = jax.random.normal(kk, (n, 2, nx, ny), dtype=jnp.float32)
    mask = (jax.random.uniform(km, (n, 2, nx, ny)) > 0.5).astype(jnp.float32)

    ref = np.asarray(_reference(x, k0, mask))
    scale = float(np.max(np.abs(ref))) + 1e-6

    # Full-precision MXU path: tight tolerance.
    out_f32 = jax.block_until_ready(
        data_consistency_in_kspace(x, k0, mask, mxu_dtype=jnp.float32))
    err_f32 = float(np.max(np.abs(np.asarray(out_f32) - ref)))
    if err_f32 > 1e-3 * scale + 1e-4:
        raise AssertionError(f"f32 MXU path mismatch: max abs err {err_f32}")

    # Default bf16-operand MXU path (f32 accumulation): looser tolerance.
    out_bf16 = jax.block_until_ready(data_consistency_in_kspace(x, k0, mask))
    err_bf16 = float(np.max(np.abs(np.asarray(out_bf16) - ref)))
    if err_bf16 > 5e-2 * scale + 1e-3:
        raise AssertionError(f"bf16 MXU path mismatch: max abs err {err_bf16}")

    print("KERNEL_OK")
</pallas_src>

<mosaic_0001>
module attributes {stable_mosaic.version = 11 : i64} {
  func.func @kernel(%arg0: i32, %arg1: memref<1x2x16x128xf32, #tpu.memory_space<vmem>>, %arg2: memref<1x2x16x128xf32, #tpu.memory_space<vmem>>, %arg3: memref<16x16xf32, #tpu.memory_space<vmem>>, %arg4: memref<16x16xf32, #tpu.memory_space<vmem>>, %arg5: memref<16x16xf32, #tpu.memory_space<vmem>>, %arg6: memref<16x16xf32, #tpu.memory_space<vmem>>, %arg7: memref<16x16xf32, #tpu.memory_space<vmem>>, %arg8: memref<128x128xf32, #tpu.memory_space<vmem>>, %arg9: memref<128x128xf32, #tpu.memory_space<vmem>>, %arg10: memref<128x128xf32, #tpu.memory_space<vmem>>, %arg11: memref<128x128xf32, #tpu.memory_space<vmem>>, %arg12: memref<128x128xf32, #tpu.memory_space<vmem>>, %arg13: memref<1x2x16x128xf32, #tpu.memory_space<vmem>>) attributes {dimension_semantics = [#tpu.dimension_semantics<parallel>], iteration_bounds = array<i64: 2>, scalar_prefetch = 0 : i64, scratch_operands = 0 : i64, tpu.core_type = #tpu.core_type<tc>, window_params = [{transform_indices = @transform_0, window_bounds = array<i64: 1, 2, 16, 128>}, {transform_indices = @transform_1, window_bounds = array<i64: 1, 2, 16, 128>}, {pipeline_mode = #tpu.pipeline_mode<synchronous>, transform_indices = @transform_2, window_bounds = array<i64: 16, 16>}, {pipeline_mode = #tpu.pipeline_mode<synchronous>, transform_indices = @transform_3, window_bounds = array<i64: 16, 16>}, {pipeline_mode = #tpu.pipeline_mode<synchronous>, transform_indices = @transform_4, window_bounds = array<i64: 16, 16>}, {pipeline_mode = #tpu.pipeline_mode<synchronous>, transform_indices = @transform_5, window_bounds = array<i64: 16, 16>}, {pipeline_mode = #tpu.pipeline_mode<synchronous>, transform_indices = @transform_6, window_bounds = array<i64: 16, 16>}, {pipeline_mode = #tpu.pipeline_mode<synchronous>, transform_indices = @transform_7, window_bounds = array<i64: 128, 128>}, {pipeline_mode = #tpu.pipeline_mode<synchronous>, transform_indices = @transform_8, window_bounds = array<i64: 128, 128>}, {pipeline_mode = #tpu.pipeline_mode<synchronous>, transform_indices = @transform_9, window_bounds = array<i64: 128, 128>}, {pipeline_mode = #tpu.pipeline_mode<synchronous>, transform_indices = @transform_10, window_bounds = array<i64: 128, 128>}, {pipeline_mode = #tpu.pipeline_mode<synchronous>, transform_indices = @transform_11, window_bounds = array<i64: 128, 128>}, {transform_indices = @transform_12, window_bounds = array<i64: 1, 2, 16, 128>}]} {
    %c0 = arith.constant 0 : index
    %c0_0 = arith.constant 0 : index
    %0 = vector.load %arg3[%c0, %c0_0] : memref<16x16xf32, #tpu.memory_space<vmem>>, vector<16x16xf32>
    %c0_1 = arith.constant 0 : index
    %c0_2 = arith.constant 0 : index
    %1 = vector.load %arg4[%c0_1, %c0_2] : memref<16x16xf32, #tpu.memory_space<vmem>>, vector<16x16xf32>
    %c0_3 = arith.constant 0 : index
    %c0_4 = arith.constant 0 : index
    %2 = vector.load %arg5[%c0_3, %c0_4] : memref<16x16xf32, #tpu.memory_space<vmem>>, vector<16x16xf32>
    %c0_5 = arith.constant 0 : index
    %c0_6 = arith.constant 0 : index
    %3 = vector.load %arg6[%c0_5, %c0_6] : memref<16x16xf32, #tpu.memory_space<vmem>>, vector<16x16xf32>
    %c0_7 = arith.constant 0 : index
    %c0_8 = arith.constant 0 : index
    %4 = vector.load %arg7[%c0_7, %c0_8] : memref<16x16xf32, #tpu.memory_space<vmem>>, vector<16x16xf32>
    %c0_9 = arith.constant 0 : index
    %c0_10 = arith.constant 0 : index
    %5 = vector.load %arg8[%c0_9, %c0_10] : memref<128x128xf32, #tpu.memory_space<vmem>>, vector<128x128xf32>
    %c0_11 = arith.constant 0 : index
    %c0_12 = arith.constant 0 : index
    %6 = vector.load %arg9[%c0_11, %c0_12] : memref<128x128xf32, #tpu.memory_space<vmem>>, vector<128x128xf32>
    %c0_13 = arith.constant 0 : index
    %c0_14 = arith.constant 0 : index
    %7 = vector.load %arg10[%c0_13, %c0_14] : memref<128x128xf32, #tpu.memory_space<vmem>>, vector<128x128xf32>
    %c0_15 = arith.constant 0 : index
    %c0_16 = arith.constant 0 : index
    %8 = vector.load %arg11[%c0_15, %c0_16] : memref<128x128xf32, #tpu.memory_space<vmem>>, vector<128x128xf32>
    %c0_17 = arith.constant 0 : index
    %c0_18 = arith.constant 0 : index
    %9 = vector.load %arg12[%c0_17, %c0_18] : memref<128x128xf32, #tpu.memory_space<vmem>>, vector<128x128xf32>
    %c0_i32 = arith.constant 0 : i32
    %10 = arith.index_cast %c0_i32 : i32 to index
    %c0_19 = arith.constant 0 : index
    %c0_20 = arith.constant 0 : index
    %c0_21 = arith.constant 0 : index
    %11 = vector.load %arg1[%10, %c0_19, %c0_20, %c0_21] : memref<1x2x16x128xf32, #tpu.memory_space<vmem>>, vector<1x1x16x128xf32>
    %12 = vector.shape_cast %11 : vector<1x1x16x128xf32> to vector<16x128xf32>
    %13 = arith.index_cast %c0_i32 : i32 to index
    %c1 = arith.constant 1 : index
    %c0_22 = arith.constant 0 : index
    %c0_23 = arith.constant 0 : index
    %14 = vector.load %arg1[%13, %c1, %c0_22, %c0_23] : memref<1x2x16x128xf32, #tpu.memory_space<vmem>>, vector<1x1x16x128xf32>
    %15 = vector.shape_cast %14 : vector<1x1x16x128xf32> to vector<16x128xf32>
    %16 = arith.addf %12, %15 : vector<16x128xf32>
    %cst = arith.constant dense<0.000000e+00> : vector<16x128xf32>
    %17 = tpu.matmul %12, %5, %cst {dimension_numbers = #tpu.dot_dimension_numbers<[1], [0], [0], [1], [0, 0, 1, 1], [], []>} : vector<16x128xf32>, vector<128x128xf32>, vector<16x128xf32> -> vector<16x128xf32>
    %cst_24 = arith.constant dense<0.000000e+00> : vector<16x128xf32>
    %18 = tpu.matmul %15, %6, %cst_24 {dimension_numbers = #tpu.dot_dimension_numbers<[1], [0], [0], [1], [0, 0, 1, 1], [], []>} : vector<16x128xf32>, vector<128x128xf32>, vector<16x128xf32> -> vector<16x128xf32>
    %cst_25 = arith.constant dense<0.000000e+00> : vector<16x128xf32>
    %19 = tpu.matmul %16, %7, %cst_25 {dimension_numbers = #tpu.dot_dimension_numbers<[1], [0], [0], [1], [0, 0, 1, 1], [], []>} : vector<16x128xf32>, vector<128x128xf32>, vector<16x128xf32> -> vector<16x128xf32>
    %20 = arith.subf %17, %18 : vector<16x128xf32>
    %21 = arith.subf %19, %17 : vector<16x128xf32>
    %22 = arith.subf %21, %18 : vector<16x128xf32>
    %23 = arith.addf %20, %22 : vector<16x128xf32>
    %cst_26 = arith.constant dense<0.000000e+00> : vector<16x128xf32>
    %24 = tpu.matmul %0, %20, %cst_26 {dimension_numbers = #tpu.dot_dimension_numbers<[1], [0], [0], [1], [0, 0, 1, 1], [], []>} : vector<16x16xf32>, vector<16x128xf32>, vector<16x128xf32> -> vector<16x128xf32>
    %cst_27 = arith.constant dense<0.000000e+00> : vector<16x128xf32>
    %25 = tpu.matmul %1, %22, %cst_27 {dimension_numbers = #tpu.dot_dimension_numbers<[1], [0], [0], [1], [0, 0, 1, 1], [], []>} : vector<16x16xf32>, vector<16x128xf32>, vector<16x128xf32> -> vector<16x128xf32>
    %cst_28 = arith.constant dense<0.000000e+00> : vector<16x128xf32>
    %26 = tpu.matmul %2, %23, %cst_28 {dimension_numbers = #tpu.dot_dimension_numbers<[1], [0], [0], [1], [0, 0, 1, 1], [], []>} : vector<16x16xf32>, vector<16x128xf32>, vector<16x128xf32> -> vector<16x128xf32>
    %27 = arith.subf %24, %25 : vector<16x128xf32>
    %28 = arith.subf %26, %24 : vector<16x128xf32>
    %29 = arith.subf %28, %25 : vector<16x128xf32>
    %30 = arith.index_cast %c0_i32 : i32 to index
    %c0_29 = arith.constant 0 : index
    %c0_30 = arith.constant 0 : index
    %c0_31 = arith.constant 0 : index
    %31 = vector.load %arg2[%30, %c0_29, %c0_30, %c0_31] : memref<1x2x16x128xf32, #tpu.memory_space<vmem>>, vector<1x1x16x128xf32>
    %32 = vector.shape_cast %31 : vector<1x1x16x128xf32> to vector<16x128xf32>
    %33 = arith.index_cast %c0_i32 : i32 to index
    %c1_32 = arith.constant 1 : index
    %c0_33 = arith.constant 0 : index
    %c0_34 = arith.constant 0 : index
    %34 = vector.load %arg2[%33, %c1_32, %c0_33, %c0_34] : memref<1x2x16x128xf32, #tpu.memory_space<vmem>>, vector<1x1x16x128xf32>
    %35 = vector.shape_cast %34 : vector<1x1x16x128xf32> to vector<16x128xf32>
    %cst_35 = arith.constant 1.000000e+00 : f32
    %36 = vector.broadcast %cst_35 : f32 to vector<16x128xf32>
    %37 = arith.subf %36, %12 : vector<16x128xf32>
    %cst_36 = arith.constant 0.000000e+00 : f32
    %38 = vector.broadcast %cst_36 : f32 to vector<16x128xf32>
    %39 = arith.subf %38, %15 : vector<16x128xf32>
    %40 = arith.mulf %37, %27 : vector<16x128xf32>
    %41 = arith.mulf %39, %29 : vector<16x128xf32>
    %42 = arith.subf %40, %41 : vector<16x128xf32>
    %43 = arith.mulf %12, %32 : vector<16x128xf32>
    %44 = arith.mulf %15, %35 : vector<16x128xf32>
    %45 = arith.subf %43, %44 : vector<16x128xf32>
    %46 = arith.addf %42, %45 : vector<16x128xf32>
    %47 = arith.mulf %37, %29 : vector<16x128xf32>
    %48 = arith.mulf %39, %27 : vector<16x128xf32>
    %49 = arith.addf %47, %48 : vector<16x128xf32>
    %50 = arith.mulf %12, %35 : vector<16x128xf32>
    %51 = arith.mulf %15, %32 : vector<16x128xf32>
    %52 = arith.addf %50, %51 : vector<16x128xf32>
    %53 = arith.addf %49, %52 : vector<16x128xf32>
    %54 = arith.addf %46, %53 : vector<16x128xf32>
    %cst_37 = arith.constant dense<0.000000e+00> : vector<16x128xf32>
    %55 = tpu.matmul %0, %46, %cst_37 {dimension_numbers = #tpu.dot_dimension_numbers<[1], [0], [0], [1], [0, 0, 1, 1], [], []>} : vector<16x16xf32>, vector<16x128xf32>, vector<16x128xf32> -> vector<16x128xf32>
    %cst_38 = arith.constant dense<0.000000e+00> : vector<16x128xf32>
    %56 = tpu.matmul %3, %53, %cst_38 {dimension_numbers = #tpu.dot_dimension_numbers<[1], [0], [0], [1], [0, 0, 1, 1], [], []>} : vector<16x16xf32>, vector<16x128xf32>, vector<16x128xf32> -> vector<16x128xf32>
    %cst_39 = arith.constant dense<0.000000e+00> : vector<16x128xf32>
    %57 = tpu.matmul %4, %54, %cst_39 {dimension_numbers = #tpu.dot_dimension_numbers<[1], [0], [0], [1], [0, 0, 1, 1], [], []>} : vector<16x16xf32>, vector<16x128xf32>, vector<16x128xf32> -> vector<16x128xf32>
    %58 = arith.subf %55, %56 : vector<16x128xf32>
    %59 = arith.subf %57, %55 : vector<16x128xf32>
    %60 = arith.subf %59, %56 : vector<16x128xf32>
    %61 = arith.addf %58, %60 : vector<16x128xf32>
    %cst_40 = arith.constant dense<0.000000e+00> : vector<16x128xf32>
    %62 = tpu.matmul %58, %5, %cst_40 {dimension_numbers = #tpu.dot_dimension_numbers<[1], [0], [0], [1], [0, 0, 1, 1], [], []>} : vector<16x128xf32>, vector<128x128xf32>, vector<16x128xf32> -> vector<16x128xf32>
    %cst_41 = arith.constant dense<0.000000e+00> : vector<16x128xf32>
    %63 = tpu.matmul %60, %8, %cst_41 {dimension_numbers = #tpu.dot_dimension_numbers<[1], [0], [0], [1], [0, 0, 1, 1], [], []>} : vector<16x128xf32>, vector<128x128xf32>, vector<16x128xf32> -> vector<16x128xf32>
    %cst_42 = arith.constant dense<0.000000e+00> : vector<16x128xf32>
    %64 = tpu.matmul %61, %9, %cst_42 {dimension_numbers = #tpu.dot_dimension_numbers<[1], [0], [0], [1], [0, 0, 1, 1], [], []>} : vector<16x128xf32>, vector<128x128xf32>, vector<16x128xf32> -> vector<16x128xf32>
    %65 = arith.subf %62, %63 : vector<16x128xf32>
    %66 = arith.subf %64, %62 : vector<16x128xf32>
    %67 = arith.subf %66, %63 : vector<16x128xf32>
    %68 = arith.index_cast %c0_i32 : i32 to index
    %c0_43 = arith.constant 0 : index
    %c0_44 = arith.constant 0 : index
    %c0_45 = arith.constant 0 : index
    %69 = vector.load %arg13[%68, %c0_43, %c0_44, %c0_45] : memref<1x2x16x128xf32, #tpu.memory_space<vmem>>, vector<1x1x16x128xf32>
    %70 = vector.shape_cast %69 : vector<1x1x16x128xf32> to vector<16x128xf32>
    %71 = vector.shape_cast %65 : vector<16x128xf32> to vector<1x1x16x128xf32>
    tpu.vector_store %arg13[%68, %c0_43, %c0_44, %c0_45], %71 {strides = array<i32>} : memref<1x2x16x128xf32, #tpu.memory_space<vmem>>, vector<1x1x16x128xf32>,
    %72 = arith.index_cast %c0_i32 : i32 to index
    %c1_46 = arith.constant 1 : index
    %c0_47 = arith.constant 0 : index
    %c0_48 = arith.constant 0 : index
    %73 = vector.load %arg13[%72, %c1_46, %c0_47, %c0_48] : memref<1x2x16x128xf32, #tpu.memory_space<vmem>>, vector<1x1x16x128xf32>
    %74 = vector.shape_cast %73 : vector<1x1x16x128xf32> to vector<16x128xf32>
    %75 = vector.shape_cast %67 : vector<16x128xf32> to vector<1x1x16x128xf32>
    tpu.vector_store %arg13[%72, %c1_46, %c0_47, %c0_48], %75 {strides = array<i32>} : memref<1x2x16x128xf32, #tpu.memory_space<vmem>>, vector<1x1x16x128xf32>,
    %c1_i32 = arith.constant 1 : i32
    return
  }
  func.func @transform_0(%arg0: i32) -> (i32, i32, i32, i32) {
    %c0_i32 = arith.constant 0 : i32
    %c0_i32_0 = arith.constant 0 : i32
    %c0_i32_1 = arith.constant 0 : i32
    %c0_i32_2 = arith.constant 0 : i32
    return %arg0, %c0_i32, %c0_i32_0, %c0_i32_1 : i32, i32, i32, i32
  }
  func.func @transform_1(%arg0: i32) -> (i32, i32, i32, i32) {
    %c0_i32 = arith.constant 0 : i32
    %c0_i32_0 = arith.constant 0 : i32
    %c0_i32_1 = arith.constant 0 : i32
    %c0_i32_2 = arith.constant 0 : i32
    return %arg0, %c0_i32, %c0_i32_0, %c0_i32_1 : i32, i32, i32, i32
  }
  func.func @transform_2(%arg0: i32) -> (i32, i32) {
    %c0_i32 = arith.constant 0 : i32
    %c0_i32_0 = arith.constant 0 : i32
    %c0_i32_1 = arith.constant 0 : i32
    return %c0_i32, %c0_i32_0 : i32, i32
  }
  func.func @transform_3(%arg0: i32) -> (i32, i32) {
    %c0_i32 = arith.constant 0 : i32
    %c0_i32_0 = arith.constant 0 : i32
    %c0_i32_1 = arith.constant 0 : i32
    return %c0_i32, %c0_i32_0 : i32, i32
  }
  func.func @transform_4(%arg0: i32) -> (i32, i32) {
    %c0_i32 = arith.constant 0 : i32
    %c0_i32_0 = arith.constant 0 : i32
    %c0_i32_1 = arith.constant 0 : i32
    return %c0_i32, %c0_i32_0 : i32, i32
  }
  func.func @transform_5(%arg0: i32) -> (i32, i32) {
    %c0_i32 = arith.constant 0 : i32
    %c0_i32_0 = arith.constant 0 : i32
    %c0_i32_1 = arith.constant 0 : i32
    return %c0_i32, %c0_i32_0 : i32, i32
  }
  func.func @transform_6(%arg0: i32) -> (i32, i32) {
    %c0_i32 = arith.constant 0 : i32
    %c0_i32_0 = arith.constant 0 : i32
    %c0_i32_1 = arith.constant 0 : i32
    return %c0_i32, %c0_i32_0 : i32, i32
  }
  func.func @transform_7(%arg0: i32) -> (i32, i32) {
    %c0_i32 = arith.constant 0 : i32
    %c0_i32_0 = arith.constant 0 : i32
    %c0_i32_1 = arith.constant 0 : i32
    return %c0_i32, %c0_i32_0 : i32, i32
  }
  func.func @transform_8(%arg0: i32) -> (i32, i32) {
    %c0_i32 = arith.constant 0 : i32
    %c0_i32_0 = arith.constant 0 : i32
    %c0_i32_1 = arith.constant 0 : i32
    return %c0_i32, %c0_i32_0 : i32, i32
  }
  func.func @transform_9(%arg0: i32) -> (i32, i32) {
    %c0_i32 = arith.constant 0 : i32
    %c0_i32_0 = arith.constant 0 : i32
    %c0_i32_1 = arith.constant 0 : i32
    return %c0_i32, %c0_i32_0 : i32, i32
  }
  func.func @transform_10(%arg0: i32) -> (i32, i32) {
    %c0_i32 = arith.constant 0 : i32
    %c0_i32_0 = arith.constant 0 : i32
    %c0_i32_1 = arith.constant 0 : i32
    return %c0_i32, %c0_i32_0 : i32, i32
  }
  func.func @transform_11(%arg0: i32) -> (i32, i32) {
    %c0_i32 = arith.constant 0 : i32
    %c0_i32_0 = arith.constant 0 : i32
    %c0_i32_1 = arith.constant 0 : i32
    return %c0_i32, %c0_i32_0 : i32, i32
  }
  func.func @transform_12(%arg0: i32) -> (i32, i32, i32, i32) {
    %c0_i32 = arith.constant 0 : i32
    %c0_i32_0 = arith.constant 0 : i32
    %c0_i32_1 = arith.constant 0 : i32
    %c0_i32_2 = arith.constant 0 : i32
    return %arg0, %c0_i32, %c0_i32_0, %c0_i32_1 : i32, i32, i32, i32
  }
}

</mosaic_0001>

<bundles_post_ra>
// kernel: tpu_custom_call.1
= control target key start
LH: loop header
LB: loop body
LE: loop exit
PB: predicated region body
PF: predicated region fallthrough
CT: control target
= control target key end

     0   :  { %s3757_s0 = inlined_call_operand.hbm [shape: f32[2,2,16,128], index: 0, kind: input, shape index: {}]   ;;  %s3758_s1 = inlined_call_operand.hbm [shape: f32[2,2,16,128], index: 1, kind: input, shape index: {}]   ;;  %s3759_s2 = inlined_call_operand.hbm [shape: f32[16,16], index: 2, kind: input, shape index: {}]   ;;  %s3760_s3 = inlined_call_operand.hbm [shape: f32[16,16], index: 3, kind: input, shape index: {}]   ;;  %s3761_s4 = inlined_call_operand.hbm [shape: f32[16,16], index: 4, kind: input, shape index: {}]   ;;  %s3762_s5 = inlined_call_operand.vmem [shape: f32[16,16], index: 5, kind: input, shape index: {}]   ;;  %s3763_s6 = inlined_call_operand.hbm [shape: f32[16,16], index: 6, kind: input, shape index: {}]   ;;  %s3764_s7 = inlined_call_operand.hbm [shape: f32[128,128], index: 7, kind: input, shape index: {}]   ;;  %s3765_s8 = inlined_call_operand.hbm [shape: f32[128,128], index: 8, kind: input, shape index: {}]   ;;  %s3766_s9 = inlined_call_operand.hbm [shape: f32[128,128], index: 9, kind: input, shape index: {}]   ;;  %s3767_s10 = inlined_call_operand.hbm [shape: f32[128,128], index: 10, kind: input, shape index: {}]   ;;  %s3768_s11 = inlined_call_operand.hbm [shape: f32[128,128], index: 11, kind: input, shape index: {}]   ;;  %s3769_s12 = inlined_call_operand.hbm [shape: f32[2,2,16,128], index: 12, kind: output, shape index: {}]  }
   0x1   :  { %3781 = sst [smem:[#allocation30_spill]] %s3757_s0 }
   0x2   :  { %3782 = sst [smem:[#allocation31_spill]] %s3758_s1 }
   0x3   :  { %3783 = sst [smem:[#allocation32_spill]] %s3759_s2 }
   0x4   :  { %3784 = sst [smem:[#allocation33_spill]] %s3760_s3 }
   0x5   :  { %3785 = sst [smem:[#allocation34_spill]] %s3761_s4 }
   0x6   :  { %3786 = sst [smem:[#allocation35_spill]] %s3762_s5 }
   0x7   :  { %3787 = sst [smem:[#allocation36_spill]] %s3763_s6 }
   0x8   :  { %3788 = sst [smem:[#allocation37_spill]] %s3764_s7 }
   0x9   :  { %3789 = sst [smem:[#allocation38_spill]] %s3765_s8 }
   0xa   :  { %3790 = sst [smem:[#allocation39_spill]] %s3766_s9 }
   0xb   :  { %3791 = sst [smem:[#allocation40_spill]] %s3769_s12 }
   0xc   :  { %17 = vsyncpa [#allocation3], 0 }
   0xd   :  { %19 = vsyncpa [#allocation3 + $0x1], 0 }
   0xe   :  { %20 = vsyncpa [#allocation6], 0 }
   0xf   :  { %22 = vsyncpa [#allocation6 + $0x1], 0 }
  0x10   :  { %23 = vsyncpa [#allocation9], 0 }
  0x11   :  { %24 = vsyncpa [#allocation12], 0 }
  0x12   :  { %25 = vsyncpa [#allocation15], 0 }
  0x13   :  { %26 = vsyncpa [#allocation18], 0 }
  0x14   :  { %27 = vsyncpa [#allocation4], 0 }
  0x15   :  { %29 = vsyncpa [#allocation4 + $0x1], 0  ;;  %s3185_s21 = smov 0   ;;  %s3187_s22 = smov 0  }
  0x16   :  { %s3189_s23 = smov 0   ;;  %s3191_s24 = smov 0  }
  0x17 LB: > { %s3104_s25 = smov [#allocation7]   ;;  %s3206_s27 = sadd.s32 4294967295, %s3102_s24   ;;  %s3102_s24 = sphi %s3191_s24, %s3832_s24   ;;  %s3098_s23 = sphi %s3189_s23, %s3831_s23   ;;  %s3094_s22 = sphi %s3187_s22, %s3830_s22   ;;  %s3090_s21 = sphi %s3185_s21, %s3829_s21  }
  0x18   : > { %s340_s26 = sshll.u32 %s3104_s25, 4  ;;  %p1898_p0 = scmp.ge.s32.totalorder %s3102_s24, 1  ;;  %s3211_s26 = int_to_ptr.vmem [resolvable:$true] %s340_s26 }
  0x19   : > { %p3774_p1 = scmp.eq.s32.totalorder %s3206_s27, 0  ;;  %p328_p2 = scmp.lt.s32.totalorder %s3102_s24, 3 }
  0x1a   : > { %s3105_s29 = smov [#allocation8]   ;;  %s3106_s14 = smov [#allocation11]  }
  0x1b   : > { %p3213_p3 = pnand %p1898_p0, %p328_p2  ;;  %s353_s30 = sshll.u32 %s3105_s29, 4  ;;  %s3226_s30 = int_to_ptr.vmem [resolvable:$true] %s353_s30 }
  0x1c   : > { %s382_s15 = sshll.u32 %s3106_s14, 4  ;;  %s3795_s2 = sld [smem:[#allocation32_spill]]  ;;  %s3228_s15 = int_to_ptr.vmem [resolvable:$true] %s382_s15 }
  0x1d   : > { %s3792_s28 = scalar_select %p3213_p3, 1, 0 }
  0x1e   : > { %p2596_p5 = pneg %p3213_p3 }
  0x1f   : > { %3793 = sst [smem:[#allocation29_spill]] %s3792_s28 }
  0x20   : > { %p3222_p6 = pnand %p2596_p5, %p3774_p1 }
  0x22   : > { %s2700_s18 = scalar_lea.hbm %s3795_s2, 256  ;;  %p3238_p8 = pneg %p3222_p6 }
  0x23   : > { %p2701_p7 = scmp.ne.s32.totalorder %s3795_s2, %s2700_s18  ;;  %p2707_p11 = scmp.lt.u32.totalorder %s2700_s18, %s3795_s2 }
  0x25   : > { %p2703_p9 = pnand %p3238_p8, %p2701_p7 }
  0x27   : > { %p2704_p10 = pneg %p2703_p9 }
  0x29   : > { %p2709_p12 = pnand %p2707_p11, %p2704_p10 }
  0x2b   : > { %2712 = shalt.err (!%p2709_p12)
}
  0x2c   : > { %s2713_s16 = scalar_lea.vmem %s3211_s26, 256  ;;  %p2721_p5 = scmp.lt.s32.totalorder %s3211_s26, %s3211_s26 }
  0x2d   : > { %p2714_p13 = scmp.ne.s32.totalorder %s3211_s26, %s2713_s16  ;;  %p2722_p4 = scmp.lt.s32.totalorder %s2713_s16, %s2713_s16 }
  0x2f   : > { %p2716_p0 = pnand %p2714_p13, %p3238_p8  ;;  %p2723_p7 = por %p2722_p4, %p2721_p5 }
  0x31   : > { %p2717_p2 = pneg %p2716_p0 }
  0x33   : > { %p2724_p9 = pnand %p2723_p7, %p2717_p2 }
  0x35   : > { %2727 = shalt.err (!%p2724_p9)
}
  0x36   : > { %s3776_s17 = smov 128   ;;  %s3778_s18 = smov 8  }
  0x37   : > { %2599 = dma.hbm_to_vmem [thread:$0]  (!%p3222_p6), %s3795_s2, 256, %s3211_s26, [#allocation6], %s3776_s17, %s3776_s17, %s3778_s18  }
  0x38   : > { %s3797_s3 = sld [smem:[#allocation33_spill]] }
  0x3e   : > { %s2728_s16 = scalar_lea.hbm %s3797_s3, 256 }
  0x3f   : > { %p2729_p4 = scmp.ne.s32.totalorder %s3797_s3, %s2728_s16  ;;  %p2735_p12 = scmp.lt.u32.totalorder %s2728_s16, %s3797_s3 }
  0x41   : > { %p2731_p10 = pnand %p2729_p4, %p3238_p8 }
  0x43   : > { %p2732_p11 = pneg %p2731_p10 }
  0x45   : > { %p2737_p13 = pnand %p2735_p12, %p2732_p11 }
  0x47   : > { %2740 = shalt.err (!%p2737_p13)
}
  0x48   : > { %s2741_s26 = scalar_lea.vmem %s3226_s30, 256  ;;  %p2749_p7 = scmp.lt.s32.totalorder %s3226_s30, %s3226_s30 }
  0x49   : > { %p2742_p0 = scmp.ne.s32.totalorder %s3226_s30, %s2741_s26  ;;  %p2750_p9 = scmp.lt.s32.totalorder %s2741_s26, %s2741_s26 }
  0x4b   : > { %p2744_p2 = pnand %p2742_p0, %p3238_p8  ;;  %p2751_p4 = por %p2750_p9, %p2749_p7 }
  0x4d   : > { %p2745_p5 = pneg %p2744_p2 }
  0x4f   : > { %p2752_p10 = pnand %p2751_p4, %p2745_p5 }
  0x51   : > { %2755 = shalt.err (!%p2752_p10)
}
  0x52   : > { %2602 = dma.hbm_to_vmem [thread:$0]  (!%p3222_p6), %s3797_s3, 256, %s3226_s30, [#allocation9], %s3776_s17, %s3776_s17, %s3778_s18  }
  0x53   : > { %s3798_s6 = sld [smem:[#allocation36_spill]] }
  0x59   : > { %s2756_s19 = scalar_lea.hbm %s3798_s6, 256 }
  0x5a   : > { %p2757_p11 = scmp.ne.s32.totalorder %s3798_s6, %s2756_s19  ;;  %p2763_p0 = scmp.lt.u32.totalorder %s2756_s19, %s3798_s6 }
  0x5c   : > { %p2759_p12 = pnand %p2757_p11, %p3238_p8 }
  0x5e   : > { %p2760_p13 = pneg %p2759_p12 }
  0x60   : > { %p2765_p2 = pnand %p2763_p0, %p2760_p13 }
  0x62   : > { %2768 = shalt.err (!%p2765_p2)
}
  0x63   : > { %s2769_s30 = scalar_lea.vmem %s3228_s15, 256  ;;  %p2777_p4 = scmp.lt.s32.totalorder %s3228_s15, %s3228_s15 }
  0x64   : > { %p2770_p5 = scmp.ne.s32.totalorder %s3228_s15, %s2769_s30  ;;  %p2778_p10 = scmp.lt.s32.totalorder %s2769_s30, %s2769_s30 }
  0x66   : > { %p2772_p7 = pnand %p2770_p5, %p3238_p8  ;;  %p2779_p11 = por %p2778_p10, %p2777_p4 }
  0x68   : > { %p2773_p9 = pneg %p2772_p7 }
  0x6a   : > { %p2780_p12 = pnand %p2779_p11, %p2773_p9 }
  0x6c   : > { %2783 = shalt.err (!%p2780_p12)
}
  0x6d   : > { %2608 = dma.hbm_to_vmem [thread:$0]  (!%p3222_p6), %s3798_s6, 256, %s3228_s15, [#allocation12], %s3776_s17, %s3776_s17, %s3778_s18  }
  0x6e   : > { %s3109_s5 = smov [#allocation14]   ;;  %s3110_s28 = smov [#allocation17]  }
  0x6f   : > { %s408_s12 = sshll.u32 %s3109_s5, 4  ;;  %s434_s19 = sshll.u32 %s3110_s28, 4  ;;  %s409_s12 = int_to_ptr.vmem [resolvable:$true] %s408_s12  ;;  %s435_s19 = int_to_ptr.vmem [resolvable:$true] %s434_s19 }
  0x70   : > { %s3799_s8 = sld [smem:[#allocation38_spill]] }
  0x76   : > { %s2784_s14 = scalar_lea.hbm %s3799_s8, 2048 }
  0x77   : > { %p2785_p13 = scmp.ne.s32.totalorder %s3799_s8, %s2784_s14  ;;  %p2791_p5 = scmp.lt.u32.totalorder %s2784_s14, %s3799_s8 }
  0x79   : > { %p2787_p0 = pnand %p2785_p13, %p3238_p8 }
  0x7b   : > { %p2788_p2 = pneg %p2787_p0 }
  0x7d   : > { %p2793_p7 = pnand %p2791_p5, %p2788_p2 }
  0x7f   : > { %2796 = shalt.err (!%p2793_p7)
}
  0x80   : > { %s2797_s15 = scalar_lea.vmem %s409_s12, 2048  ;;  %p2805_p11 = scmp.lt.s32.totalorder %s409_s12, %s409_s12 }
  0x81   : > { %p2798_p9 = scmp.ne.s32.totalorder %s409_s12, %s2797_s15  ;;  %p2806_p12 = scmp.lt.s32.totalorder %s2797_s15, %s2797_s15 }
  0x83   : > { %p2800_p4 = pnand %p2798_p9, %p3238_p8  ;;  %p2807_p1 = por %p2806_p12, %p2805_p11 }
  0x85   : > { %p2801_p10 = pneg %p2800_p4 }
  0x87   : > { %p2808_p3 = pnand %p2807_p1, %p2801_p10 }
  0x89   : > { %2811 = shalt.err (!%p2808_p3)
}
  0x8a   : > { %2614 = dma.hbm_to_vmem [thread:$0]  (!%p3222_p6), %s3799_s8, 2048, %s409_s12, [#allocation15], %s3776_s17, %s3776_s17, %s3778_s18  }
  0x8b   : > { %s2812_s20 = scalar_lea.hbm %s3767_s10, 2048 }
  0x8c   : > { %p2813_p1 = scmp.ne.s32.totalorder %s3767_s10, %s2812_s20  ;;  %p2819_p0 = scmp.lt.u32.totalorder %s2812_s20, %s3767_s10 }
  0x8e   : > { %p2815_p3 = pnand %p2813_p1, %p3238_p8 }
  0x90   : > { %p2816_p13 = pneg %p2815_p3 }
  0x92   : > { %p2821_p2 = pnand %p2819_p0, %p2816_p13 }
  0x94   : > { %2824 = shalt.err (!%p2821_p2)
}
  0x95   : > { %s2825_s26 = scalar_lea.vmem %s435_s19, 2048  ;;  %p2833_p4 = scmp.lt.s32.totalorder %s435_s19, %s435_s19 }
  0x96   : > { %p2826_p5 = scmp.ne.s32.totalorder %s435_s19, %s2825_s26  ;;  %p2834_p10 = scmp.lt.s32.totalorder %s2825_s26, %s2825_s26 }
  0x98   : > { %p2828_p7 = pnand %p2826_p5, %p3238_p8  ;;  %p2835_p11 = por %p2834_p10, %p2833_p4 }
  0x9a   : > { %p2829_p9 = pneg %p2828_p7 }
  0x9c   : > { %p2836_p12 = pnand %p2835_p11, %p2829_p9 }
  0x9e   : > { %2839 = shalt.err (!%p2836_p12)
}
  0x9f   : > { %2620 = dma.hbm_to_vmem [thread:$0]  (!%p3222_p6), %s3767_s10, 2048, %s435_s19, [#allocation18], %s3776_s17, %s3776_s17, %s3778_s18  }
  0xa0   : > { %s3111_s2 = smov [#allocation10]   ;;  %s3112_s5 = smov [#allocation13]  }
  0xa1   : > { %s366_s1 = sshll.u32 %s3111_s2, 4  ;;  %s395_s28 = sshll.u32 %s3112_s5, 4  ;;  %s367_s1 = int_to_ptr.vmem [resolvable:$true] %s366_s1  ;;  %s396_s28 = int_to_ptr.vmem [resolvable:$true] %s395_s28 }
  0xa2   : > { %s3800_s4 = sld [smem:[#allocation34_spill]] }
  0xa8   : > { %s2840_s14 = scalar_lea.hbm %s3800_s4, 256 }
  0xa9   : > { %p2841_p1 = scmp.ne.s32.totalorder %s3800_s4, %s2840_s14  ;;  %p2847_p0 = scmp.lt.u32.totalorder %s2840_s14, %s3800_s4 }
  0xab   : > { %p2843_p3 = pnand %p2841_p1, %p3238_p8 }
  0xad   : > { %p2844_p13 = pneg %p2843_p3 }
  0xaf   : > { %p2849_p2 = pnand %p2847_p0, %p2844_p13 }
  0xb1   : > { %2852 = shalt.err (!%p2849_p2)
}
  0xb2   : > { %s2853_s19 = scalar_lea.vmem %s367_s1, 256  ;;  %p2861_p4 = scmp.lt.s32.totalorder %s367_s1, %s367_s1 }
  0xb3   : > { %p2854_p5 = scmp.ne.s32.totalorder %s367_s1, %s2853_s19  ;;  %p2862_p10 = scmp.lt.s32.totalorder %s2853_s19, %s2853_s19 }
  0xb5   : > { %p2856_p7 = pnand %p2854_p5, %p3238_p8  ;;  %p2863_p11 = por %p2862_p10, %p2861_p4 }
  0xb7   : > { %p2857_p9 = pneg %p2856_p7 }
  0xb9   : > { %p2864_p12 = pnand %p2863_p11, %p2857_p9 }
  0xbb   : > { %2867 = shalt.err (!%p2864_p12)
}
  0xbc   : > { %2605 = dma.hbm_to_vmem [thread:$0]  (!%p3222_p6), %s3800_s4, 256, %s367_s1, [#allocation9], %s3776_s17, %s3776_s17, %s3778_s18  }
  0xbd   : > { %s3801_s7 = sld [smem:[#allocation37_spill]] }
  0xc3   : > { %s2868_s29 = scalar_lea.hbm %s3801_s7, 2048 }
  0xc4   : > { %p2869_p1 = scmp.ne.s32.totalorder %s3801_s7, %s2868_s29  ;;  %p2875_p0 = scmp.lt.u32.totalorder %s2868_s29, %s3801_s7 }
  0xc6   : > { %p2871_p3 = pnand %p2869_p1, %p3238_p8 }
  0xc8   : > { %p2872_p13 = pneg %p2871_p3 }
  0xca   : > { %p2877_p2 = pnand %p2875_p0, %p2872_p13 }
  0xcc   : > { %2880 = shalt.err (!%p2877_p2)
}
  0xcd   : > { %s2881_s12 = scalar_lea.vmem %s396_s28, 2048  ;;  %p2889_p4 = scmp.lt.s32.totalorder %s396_s28, %s396_s28 }
  0xce   : > { %p2882_p5 = scmp.ne.s32.totalorder %s396_s28, %s2881_s12  ;;  %p2890_p10 = scmp.lt.s32.totalorder %s2881_s12, %s2881_s12 }
  0xd0   : > { %p2884_p7 = pnand %p2882_p5, %p3238_p8  ;;  %p2891_p11 = por %p2890_p10, %p2889_p4 }
  0xd2   : > { %p2885_p9 = pneg %p2884_p7 }
  0xd4   : > { %p2892_p12 = pnand %p2891_p11, %p2885_p9 }
  0xd6   : > { %2895 = shalt.err (!%p2892_p12)
}
  0xd7   : > { %2611 = dma.hbm_to_vmem [thread:$0]  (!%p3222_p6), %s3801_s7, 2048, %s396_s28, [#allocation12], %s3776_s17, %s3776_s17, %s3778_s18  }
  0xd8   : > { %s3113_s15 = smov [#allocation16]   ;;  %s3114_s5 = smov [#allocation19]  }
  0xd9   : > { %s421_s2 = sshll.u32 %s3113_s15, 4  ;;  %s447_s20 = sshll.u32 %s3114_s5, 4  ;;  %s422_s2 = int_to_ptr.vmem [resolvable:$true] %s421_s2  ;;  %s448_s20 = int_to_ptr.vmem [resolvable:$true] %s447_s20 }
  0xda   : > { %s3802_s9 = sld [smem:[#allocation39_spill]] }
  0xe0   : > { %s2896_s16 = scalar_lea.hbm %s3802_s9, 2048 }
  0xe1   : > { %p2897_p1 = scmp.ne.s32.totalorder %s3802_s9, %s2896_s16  ;;  %p2903_p0 = scmp.lt.u32.totalorder %s2896_s16, %s3802_s9 }
  0xe3   : > { %p2899_p3 = pnand %p2897_p1, %p3238_p8 }
  0xe5   : > { %p2900_p13 = pneg %p2899_p3 }
  0xe7   : > { %p2905_p2 = pnand %p2903_p0, %p2900_p13 }
  0xe9   : > { %2908 = shalt.err (!%p2905_p2)
}
  0xea   : > { %s2909_s28 = scalar_lea.vmem %s422_s2, 2048  ;;  %p2917_p4 = scmp.lt.s32.totalorder %s422_s2, %s422_s2 }
  0xeb   : > { %p2910_p5 = scmp.ne.s32.totalorder %s422_s2, %s2909_s28  ;;  %p2918_p10 = scmp.lt.s32.totalorder %s2909_s28, %s2909_s28 }
  0xed   : > { %p2912_p7 = pnand %p2910_p5, %p3238_p8  ;;  %p2919_p11 = por %p2918_p10, %p2917_p4 }
  0xef   : > { %p2913_p9 = pneg %p2912_p7 }
  0xf1   : > { %p2920_p12 = pnand %p2919_p11, %p2913_p9 }
  0xf3   : > { %2923 = shalt.err (!%p2920_p12)
}
  0xf4   : > { %2617 = dma.hbm_to_vmem [thread:$0]  (!%p3222_p6), %s3802_s9, 2048, %s422_s2, [#allocation15], %s3776_s17, %s3776_s17, %s3778_s18  }
  0xf5   : > { %s2924_s14 = scalar_lea.hbm %s3768_s11, 2048 }
  0xf6   : > { %p2925_p1 = scmp.ne.s32.totalorder %s3768_s11, %s2924_s14  ;;  %p2931_p0 = scmp.lt.u32.totalorder %s2924_s14, %s3768_s11 }
  0xf8   : > { %p2927_p3 = pnand %p2925_p1, %p3238_p8 }
  0xfa   : > { %p2928_p13 = pneg %p2927_p3 }
  0xfc   : > { %p2933_p2 = pnand %p2931_p0, %p2928_p13 }
  0xfe   : > { %2936 = shalt.err (!%p2933_p2)
}
  0xff   : > { %s2937_s1 = scalar_lea.vmem %s448_s20, 2048  ;;  %p2945_p4 = scmp.lt.s32.totalorder %s448_s20, %s448_s20 }
 0x100   : > { %p2938_p5 = scmp.ne.s32.totalorder %s448_s20, %s2937_s1  ;;  %p2946_p10 = scmp.lt.s32.totalorder %s2937_s1, %s2937_s1 }
 0x102   : > { %p2940_p7 = pnand %p2938_p5, %p3238_p8  ;;  %p2947_p11 = por %p2946_p10, %p2945_p4 }
 0x104   : > { %p2941_p9 = pneg %p2940_p7 }
 0x106   : > { %p2948_p12 = pnand %p2947_p11, %p2941_p9 }
 0x108   : > { %2951 = shalt.err (!%p2948_p12)
}
 0x109   : > { %2623 = dma.hbm_to_vmem [thread:$0]  (!%p3222_p6), %s3768_s11, 2048, %s448_s20, [#allocation18], %s3776_s17, %s3776_s17, %s3778_s18  }
 0x10a   : > { %s1897_s13 = sadd.s32 4294967294, %s3102_s24   ;;  %s3442_s25 = sadd.s32 1, %s3102_s24  }
 0x10b   : > { %s42_s19 = sadd.s32 1, %s3098_s23  ;;  %s39_s15 = ssub.s32 %s3102_s24, %s3442_s25 }
 0x10c   : > { %p49_p8 = scmp.ne.s32.totalorder %s3098_s23, %s3094_s22  ;;  %p40_p1 = scmp.eq.s32.totalorder %s39_s15, 0 }
 0x10d   : > { %p50_p3 = scmp.eq.s32.totalorder %s3102_s24, 0  ;;  %p55_p13 = scmp.ne.s32.totalorder %s3094_s22, %s3090_s21 }
 0x10e   : > { %p315_p0 = scmp.eq.s32.totalorder %s3206_s27, 1  ;;  %p3803_p5 = scmp.eq.s32.totalorder %s3206_s27, 0 }
 0x10f   : > { %s3454_s5 = scalar_select %p40_p1, %s3098_s23, %s42_s19  }
 0x110   : > { %p51_p2 = por %p50_p3, %p49_p8  ;;  %p3458_p7 = por %p3803_p5, %p55_p13 }
 0x111   : > { %p3462_p6 = por %p315_p0, %p49_p8  ;;  %p321_p9 = scmp.eq.s32.totalorder %s1897_s13, 1 }
 0x112   : > { %p2644_p4 = scmp.lt.s32.totalorder %s3102_s24, 2  ;;  %s461_s14 = sand.u32 1, %s3098_s23  }
 0x113   : > { %s3805_s20 = scalar_select %p3462_p6, 1, 0 }
 0x114   : > { %p3468_p10 = por %p321_p9, %p55_p13  ;;  %s3472_s30 = sshll.u32 %s461_s14, 5 }
 0x115   : > { %s1951_s26 = sshll.u32 %s3102_s24, 9  ;;  %s3807_s0 = sld [smem:[#allocation30_spill]] }
 0x116   : > { %s3806_s16 = scalar_select %p3468_p10, 1, 0 }
 0x117   : > { %s465_s28 = scalar_lea.vmem [#allocation2], %s3472_s30  ;;  %p3481_p11 = pnand %p2644_p4, %p51_p2 }
 0x118   : > { %s472_s13 = sshll.u32 %s465_s28, 4  ;;  %s3809_s18 = sld [smem:[#allocation31_spill]]  ;;  %s3485_s13 = int_to_ptr.vmem [resolvable:$true] %s472_s13 }
 0x119   : > { %s3492_s1 = scalar_lea.sflag [#allocation3], %s461_s14  ;;  %p2954_p8 = pneg %p3481_p11 }
 0x11b   : > { %s3478_s2 = scalar_lea.hbm %s3807_s0, %s1951_s26  ;;  %s2957_s6 = scalar_lea.hbm %s3807_s0, 1024 }
 0x11c   : > { %s2952_s3 = scalar_lea.hbm %s3478_s2, 512  ;;  %p2958_p13 = scmp.lt.u32.totalorder %s3478_s2, %s3807_s0 }
 0x11d   : > { %p2953_p12 = scmp.ne.s32.totalorder %s3478_s2, %s2952_s3  ;;  %p2959_p0 = scmp.lt.u32.totalorder %s2957_s6, %s2952_s3 }
 0x11e   : > { %s3490_s12 = scalar_lea.hbm %s3809_s18, %s1951_s26  ;;  %p2961_p5 = scmp.lt.u32.totalorder %s2952_s3, %s3478_s2 }
 0x11f   : > { %p2955_p1 = pnand %p2954_p8, %p2953_p12  ;;  %p2960_p2 = por %p2959_p0, %p2958_p13 }
 0x121   : > { %p2956_p3 = pneg %p2955_p1  ;;  %p2962_p9 = por %p2961_p5, %p2960_p2 }
 0x123   : > { %p2963_p4 = pnand %p2962_p9, %p2956_p3 }
 0x125   : > { %2966 = shalt.err (!%p2963_p4)
}
 0x126   : > { %s2967_s17 = scalar_lea.vmem %s3485_s13, 512  ;;  %s3115_s4 = smov [#allocation2]  }
 0x127   : > { %p2968_p12 = scmp.ne.s32.totalorder %s3485_s13, %s2967_s17  ;;  %s2972_s14 = sshll.u32 %s3115_s4, 4  ;;  %s2973_s14 = int_to_ptr.vmem [resolvable:$false] %s2972_s14 }
 0x128   : > { %s2974_s7 = scalar_lea.vmem %s2973_s14, 1024  ;;  %p2975_p6 = scmp.lt.s32.totalorder %s3485_s13, %s2973_s14 }
 0x129   : > { %p2970_p1 = pnand %p2968_p12, %p2954_p8  ;;  %p2976_p13 = scmp.lt.s32.totalorder %s2974_s7, %s2967_s17 }
 0x12b   : > { %p2971_p10 = pneg %p2970_p1  ;;  %p2977_p0 = por %p2976_p13, %p2975_p6 }
 0x12d   : > { %p2978_p2 = pnand %p2977_p0, %p2971_p10 }
 0x12f   : > { %2981 = shalt.err (!%p2978_p2)
}
 0x130   : > { %s3810_s3 = smov 8   ;;  %s3811_s6 = smov 128  }
 0x131   : > { %2627 = dma.hbm_to_vmem [thread:$0]  (!%p3481_p11), %s3478_s2, 512, %s3485_s13, %s3492_s1, %s3811_s6, %s3811_s6, %s3810_s3  }
 0x132   : > { %s486_s8 = scalar_lea.vmem [#allocation5], %s3472_s30  ;;  %s482_s15 = sand.u32 1, %s3102_s24  }
 0x133   : > { %s493_s26 = sshll.u32 %s486_s8, 4  ;;  %s3527_s28 = scalar_lea.sflag [#allocation6], %s482_s15  ;;  %s3525_s26 = int_to_ptr.vmem [resolvable:$true] %s493_s26 }
 0x134   : > { %s2982_s17 = scalar_lea.hbm %s3490_s12, 512  ;;  %s2987_s7 = scalar_lea.hbm %s3809_s18, 1024 }
 0x135   : > { %p2983_p6 = scmp.ne.s32.totalorder %s3490_s12, %s2982_s17  ;;  %p2988_p5 = scmp.lt.u32.totalorder %s3490_s12, %s3809_s18 }
 0x136   : > { %p2989_p9 = scmp.lt.u32.totalorder %s2987_s7, %s2982_s17  ;;  %p2991_p12 = scmp.lt.u32.totalorder %s2982_s17, %s3490_s12 }
 0x137   : > { %p2985_p10 = pnand %p2983_p6, %p2954_p8 }
 0x138   : > { %p2990_p4 = por %p2989_p9, %p2988_p5 }
 0x139   : > { %p2986_p3 = pneg %p2985_p10 }
 0x13a   : > { %p2992_p1 = por %p2991_p12, %p2990_p4 }
 0x13c   : > { %p2993_p13 = pnand %p2992_p1, %p2986_p3 }
 0x13e   : > { %2996 = shalt.err (!%p2993_p13)
}
 0x13f   : > { %s2997_s30 = scalar_lea.vmem %s3525_s26, 512  ;;  %s3116_s2 = smov [#allocation5]  }
 0x140   : > { %p2998_p0 = scmp.ne.s32.totalorder %s3525_s26, %s2997_s30  ;;  %s3002_s13 = sshll.u32 %s3116_s2, 4  ;;  %s3003_s13 = int_to_ptr.vmem [resolvable:$false] %s3002_s13 }
 0x141   : > { %s3004_s0 = scalar_lea.vmem %s3003_s13, 1024  ;;  %p3005_p10 = scmp.lt.s32.totalorder %s3525_s26, %s3003_s13 }
 0x142   : > { %p3000_p2 = pnand %p2998_p0, %p2954_p8  ;;  %p3006_p5 = scmp.lt.s32.totalorder %s3004_s0, %s2997_s30 }
 0x144   : > { %p3001_p6 = pneg %p3000_p2  ;;  %p3007_p9 = por %p3006_p5, %p3005_p10 }
 0x146   : > { %p3008_p4 = pnand %p3007_p9, %p3001_p6 }
 0x148   : > { %3011 = shalt.err (!%p3008_p4)
}
 0x149   : > { %2630 = dma.hbm_to_vmem [thread:$0]  (!%p3481_p11), %s3490_s12, 512, %s3525_s26, %s3527_s28, %s3811_s6, %s3811_s6, %s3810_s3  }
 0x14a   : > { %s3812_s9 = sld [smem:[#allocation29_spill]] }
 0x150   : > { %p3813_p8 = scmp.ne.s32.totalorder %s3812_s9, 0 }
 0x151   : > { %s3559_s1 = sand.u32 (!%p3813_p8), 1, %s3094_s22  }
 0x152   : > { %505 = sbr.rel (%p3813_p8) target bundleno = 1372 (0x55c), region = 68  ;;  %s3562_s8 = sshll.u32 (!%p3813_p8), %s3559_s1, 5 }
 0x153   : > { %s508_s19 = scalar_lea.sflag (!%p3813_p8), [#allocation3], %s3559_s1  ;;  %s3566_s15 = scalar_lea.vmem (!%p3813_p8), [#allocation2], %s3562_s8 }
 0x159   : > { %3057 = dma.done.wait (%p3458_p7), %s508_s19, 512  }
 0x15a   : > { %3059 = vsyncadd (%p3458_p7), %s508_s19, 4294966784  ;;  %s516_s12 = sand.u32 1, %s3206_s27   ;;  %s3574_s6 = scalar_lea.vmem [#allocation5], %s3562_s8 }
 0x15b   : > { %s517_s3 = scalar_lea.sflag [#allocation6], %s516_s12 }
 0x15c   : > { %3061 = dma.done.wait (%p3458_p7), %s517_s3, 512  }
 0x15d   : > { %3063 = vsyncadd (%p3458_p7), %s517_s3, 4294966784  ;;  %p3814_p11 = scmp.eq.s32.totalorder %s3206_s27, 0 }
 0x15f   : > { %3065 = dma.done.wait (%p3814_p11), [#allocation6], 256   ;;  %p3815_p3 = pmov %p3814_p11 }
 0x161   : > { %3067 = vsyncadd (%p3815_p3), [#allocation6], 4294967040  ;;  %p3816_p12 = pmov %p3815_p3 }
 0x162   : > { %p3817_p1 = pmov %p3815_p3 }
 0x163   : > { %3069 = dma.done.wait (%p3816_p12), [#allocation9], 512  }
 0x164   : > { %3071 = vsyncadd (%p3817_p1), [#allocation9], 4294966784  ;;  %p3818_p13 = pmov %p3817_p1 }
 0x165   : > { %p3819_p0 = pmov %p3817_p1 }
 0x166   : > { %3073 = dma.done.wait (%p3818_p13), [#allocation12], 2304  }
 0x167   : > { %3075 = vsyncadd (%p3819_p0), [#allocation12], 4294964992  ;;  %p3820_p7 = pmov %p3819_p0 }
 0x168   : > { %p3821_p2 = pmov %p3819_p0 }
 0x169   : > { %3077 = dma.done.wait (%p3820_p7), [#allocation15], 4096  }
 0x16a   : > { %3079 = vsyncadd (%p3821_p2), [#allocation15], 4294963200  ;;  %p3822_p6 = pmov %p3819_p0 }
 0x16b   : > { %p3823_p10 = pmov %p3819_p0 }
 0x16c   : > { %3081 = dma.done.wait (%p3822_p6), [#allocation18], 4096  }
 0x16d   : > { %3083 = vsyncadd (%p3823_p10), [#allocation18], 4294963200  ;;  %v612_v0 = vld [vmem:[#allocation13] sm:$0xff]  ;;  %v613_v1 = vld [vmem:[#allocation13 + $0x8] sm:$0xff]  ;;  %vm932_vm0 = vcmask 130048   ;;  %s3824_s28 = sld [smem:[#allocation35_spill]] }
 0x16e   : > { %v628_v2 = vld [vmem:[#allocation14] sm:$0xff]  ;;  %v3600_v3 = vpack.c.bf16 %v613_v1, %v612_v0  ;;  %v629_v4 = vld [vmem:[#allocation14 + $0x8] sm:$0xff]  ;;  %v614_v5 = vld [vmem:[#allocation13 + $0x10] sm:$0xff]  ;;  %s601_s14 = scalar_lea.vmem [#allocation20], %s3562_s8  ;;  %s1953_s30 = sshll.u32 %s3206_s27, 9 }
 0x16f   : > { %v615_v6 = vld [vmem:[#allocation13 + $0x18] sm:$0xff]  ;;  %v2370_v7 = vpack.c.bf16 %v629_v4, %v628_v2  ;;  %v630_v9 = vld [vmem:[#allocation14 + $0x10] sm:$0xff]  ;;  %v616_v11 = vld [vmem:[#allocation13 + $0x20] sm:$0xff]  ;;  %s1716_s7 = sshll.u32 %s601_s14, 4  ;;  %s3825_s0 = sld [smem:[#allocation40_spill]]  ;;  %s3708_s7 = int_to_ptr.vmem [resolvable:$true] %s1716_s7 }
 0x170   : > { %v3602_v8 = vpack.c.bf16 %v615_v6, %v614_v5  ;;  %v631_v10 = vld [vmem:[#allocation14 + $0x18] sm:$0xff]  ;;  %2339 = vmatprep.subr.bf16.mxu0 %v3600_v3  ;;  %v617_v13 = vld [vmem:[#allocation13 + $0x28] sm:$0xff]  ;;  %v632_v14 = vld [vmem:[#allocation14 + $0x20] sm:$0xff]  ;;  %s1703_s8 = scalar_lea.sflag [#allocation4], %s3559_s1  ;;  %s3012_s19 = scalar_lea.vmem %s3708_s7, 512 }
 0x171   : > { %v2374_v12 = vpack.c.bf16 %v631_v10, %v630_v9  ;;  %v633_v15 = vld [vmem:[#allocation14 + $0x28] sm:$0xff]  ;;  %2371 = vmatprep.subr.bf16.mxu1 %v2370_v7  ;;  %2341 = vmatpush3.bf16.msra.mxu0 %v3600_v3  ;;  %v3607_v16 = vpack.c.bf16 %v617_v13, %v616_v11  ;;  %v618_v18 = vld [vmem:[#allocation13 + $0x30] sm:$0xff]  ;;  %v619_v19 = vld [vmem:[#allocation13 + $0x38] sm:$0xff]  ;;  %p3013_p5 = scmp.ne.s32.totalorder %s3708_s7, %s3012_s19  ;;  %p3826_p9 = scmp.ne.s32.totalorder %s3805_s20, 0 }
 0x172   : > { %2373 = vmatpush3.bf16.msra.mxu1 %v2370_v7  ;;  %2343 = vmatprep.subr.bf16.mxu0 %v3602_v8  ;;  %v2378_v17 = vpack.c.bf16 %v633_v15, %v632_v14  ;;  %v634_v20 = vld [vmem:[#allocation14 + $0x30] sm:$0xff]  ;;  %v635_v21 = vld [vmem:[#allocation14 + $0x38] sm:$0xff]  ;;  %v3611_v22 = vpack.c.bf16 %v619_v19, %v618_v18  ;;  %v620_v24 = vld [vmem:[#allocation13 + $0x40] sm:$0xff]  ;;  %s3117_s27 = smov [#allocation20]  }
 0x173   : > { %2375 = vmatprep.subr.bf16.mxu1 %v2374_v12  ;;  %v2382_v23 = vpack.c.bf16 %v635_v21, %v634_v20  ;;  %v621_v25 = vld [vmem:[#allocation13 + $0x48] sm:$0xff]  ;;  %v3614_v26 = vld [vmem:[%s3566_s15] sm:$0xff]  ;;  %v3618_v29 = vld [vmem:[%s3566_s15 + $0x10] sm:$0xff]  ;;  %p3014_p4 = pnand %p3013_p5, %p3826_p9 }
 0x174   : > { %v636_v27 = vld [vmem:[#allocation14 + $0x40] sm:$0xff]  ;;  %v637_v28 = vld [vmem:[#allocation14 + $0x48] sm:$0xff]  ;;  %2118 = vmatprep.mubr.f32.mxu0 %v3614_v26  ;;  %2153 = vmatprep.mubr.f32.mxu1 %v3618_v29  ;;  %v3623_v30 = vpack.c.bf16 %v621_v25, %v620_v24  ;;  %v622_v32 = vld [vmem:[#allocation13 + $0x50] sm:$0xff]  ;;  %v697_v58 = vadd.f32 %v3618_v29, %v3614_v26 }
 0x175   : > { %2345 = vmatpush3.bf16.msra.mxu0 %v3602_v8  ;;  %v2386_v31 = vpack.c.bf16 %v637_v28, %v636_v27  ;;  %v623_v33 = vld [vmem:[#allocation13 + $0x58] sm:$0xff]  ;;  %v638_v34 = vld [vmem:[#allocation14 + $0x50] sm:$0xff]  ;;  %v624_v38 = vld [vmem:[#allocation13 + $0x60] sm:$0xff]  ;;  %s3713_s9 = scalar_lea.hbm %s3825_s0, %s1953_s30  ;;  %p3015_p8 = pneg %p3014_p4 }
 0x176   : > { %2377 = vmatpush3.bf16.msra.mxu1 %v2374_v12  ;;  %2347 = vmatprep.subr.bf16.mxu0 %v3607_v16  ;;  %v639_v35 = vld [vmem:[#allocation14 + $0x58] sm:$0xff]  ;;  %v3627_v36 = vpack.c.bf16 %v623_v33, %v622_v32  ;;  %v625_v39 = vld [vmem:[#allocation13 + $0x68] sm:$0xff]  ;;  %v640_v40 = vld [vmem:[#allocation14 + $0x60] sm:$0xff] }
 0x177   : > { %2379 = vmatprep.subr.bf16.mxu1 %v2378_v17  ;;  %v2390_v37 = vpack.c.bf16 %v639_v35, %v638_v34  ;;  %v641_v41 = vld [vmem:[#allocation14 + $0x68] sm:$0xff]  ;;  %v3631_v42 = vpack.c.bf16 %v625_v39, %v624_v38  ;;  %v626_v44 = vld [vmem:[#allocation13 + $0x70] sm:$0xff]  ;;  %v627_v45 = vld [vmem:[#allocation13 + $0x78] sm:$0xff] }
 0x178   : > { %v2394_v43 = vpack.c.bf16 %v641_v41, %v640_v40  ;;  %v642_v46 = vld [vmem:[#allocation14 + $0x70] sm:$0xff]  ;;  %v643_v47 = vld [vmem:[#allocation14 + $0x78] sm:$0xff]  ;;  %v3635_v48 = vpack.c.bf16 %v627_v45, %v626_v44  ;;  %v644_v50 = vld [vmem:[#allocation16] sm:$0xff] }
 0x179   : > { %2349 = vmatpush3.bf16.msra.mxu0 %v3607_v16  ;;  %v2398_v49 = vpack.c.bf16 %v643_v47, %v642_v46  ;;  %v645_v51 = vld [vmem:[#allocation16 + $0x8] sm:$0xff]  ;;  %v646_v53 = vld [vmem:[#allocation16 + $0x10] sm:$0xff]  ;;  %v647_v54 = vld [vmem:[#allocation16 + $0x18] sm:$0xff] }
 0x17a   : > { %2381 = vmatpush3.bf16.msra.mxu1 %v2378_v17  ;;  %2351 = vmatprep.subr.bf16.mxu0 %v3611_v22  ;;  %v2402_v52 = vpack.c.bf16 %v645_v51, %v644_v50  ;;  %v3641_v55 = vld [vmem:[%s3566_s15 + $0x8] sm:$0xff]  ;;  %v3644_v56 = vld [vmem:[%s3566_s15 + $0x18] sm:$0xff]  ;;  %v2406_v57 = vpack.c.bf16 %v647_v54, %v646_v53  ;;  %v648_v59 = vld [vmem:[#allocation16 + $0x20] sm:$0xff]  ;;  %s3016_s15 = sshll.u32 %s3117_s27, 4  ;;  %s3017_s15 = int_to_ptr.vmem [resolvable:$false] %s3016_s15 }
 0x17b   : > { %2383 = vmatprep.subr.bf16.mxu1 %v2382_v23  ;;  %v649_v60 = vld [vmem:[#allocation16 + $0x28] sm:$0xff]  ;;  %v650_v62 = vld [vmem:[#allocation16 + $0x30] sm:$0xff]  ;;  %v651_v63 = vld [vmem:[#allocation16 + $0x38] sm:$0xff]  ;;  %v698_v15 = vadd.f32 %v3644_v56, %v3641_v55  ;;  %s3018_s12 = scalar_lea.vmem %s3017_s15, 1024  ;;  %p3019_p11 = scmp.lt.s32.totalorder %s3708_s7, %s3017_s15 }
 0x17c   : > { %v2410_v61 = vpack.c.bf16 %v649_v60, %v648_v59  ;;  %v2414_v0 = vpack.c.bf16 %v651_v63, %v650_v62  ;;  %v652_v1 = vld [vmem:[#allocation16 + $0x40] sm:$0xff]  ;;  %v653_v2 = vld [vmem:[#allocation16 + $0x48] sm:$0xff]  ;;  %v654_v5 = vld [vmem:[#allocation16 + $0x50] sm:$0xff]  ;;  %p3020_p3 = scmp.lt.s32.totalorder %s3018_s12, %s3012_s19 }
 0x17d   : > { %2353 = vmatpush3.bf16.msra.mxu0 %v3611_v22  ;;  %v2418_v4 = vpack.c.bf16 %v653_v2, %v652_v1  ;;  %v655_v6 = vld [vmem:[#allocation16 + $0x58] sm:$0xff]  ;;  %v656_v9 = vld [vmem:[#allocation16 + $0x60] sm:$0xff]  ;;  %v657_v10 = vld [vmem:[#allocation16 + $0x68] sm:$0xff] }
 0x17e   : > { %2385 = vmatpush3.bf16.msra.mxu1 %v2382_v23  ;;  %2355 = vmatprep.subr.bf16.mxu0 %v3623_v30  ;;  %v2422_v7 = vpack.c.bf16 %v655_v6, %v654_v5  ;;  %v2426_v11 = vpack.c.bf16 %v657_v10, %v656_v9  ;;  %v658_v12 = vld [vmem:[#allocation16 + $0x70] sm:$0xff]  ;;  %v659_v13 = vld [vmem:[#allocation16 + $0x78] sm:$0xff]  ;;  %v602_v17 = vld [vmem:[#allocation7] sm:$0xff]  ;;  %p3021_p12 = por %p3020_p3, %p3019_p11 }
 0x17f   : > { %2387 = vmatprep.subr.bf16.mxu1 %v2386_v31  ;;  %v2430_v14 = vpack.c.bf16 %v659_v13, %v658_v12  ;;  %v3654_v27 = vld [vmem:[#allocation7 + $0x8] sm:$0xff]  ;;  %v604_v28 = vld [vmem:[#allocation8] sm:$0xff]  ;;  %v606_v44 = vld [vmem:[#allocation10] sm:$0xff] }
 0x180   : > { %v607_v45 = vld [vmem:[#allocation10 + $0x8] sm:$0xff]  ;;  %v660_v46 = vld [vmem:[#allocation17] sm:$0xff]  ;;  %v662_v50 = vld [vmem:[#allocation17 + $0x10] sm:$0xff]  ;;  %p3022_p1 = pnand %p3021_p12, %p3015_p8 }
 0x181   : > { %2357 = vmatpush3.bf16.msra.mxu0 %v3623_v30  ;;  %v661_v47 = vld [vmem:[#allocation17 + $0x8] sm:$0xff]  ;;  %v663_v51 = vld [vmem:[#allocation17 + $0x18] sm:$0xff]  ;;  %v664_v53 = vld [vmem:[#allocation17 + $0x20] sm:$0xff] }
 0x182   : > { %2389 = vmatpush3.bf16.msra.mxu1 %v2386_v31  ;;  %2359 = vmatprep.subr.bf16.mxu0 %v3627_v36  ;;  %v665_v54 = vld [vmem:[#allocation17 + $0x28] sm:$0xff]  ;;  %v667_v59 = vld [vmem:[#allocation17 + $0x38] sm:$0xff]  ;;  %v1182_v9 = vld [vmem:[%s3574_s6] sm:$0xff] }
 0x183   : > { %2391 = vmatprep.subr.bf16.mxu1 %v2390_v37  ;;  %v669_v62 = vld [vmem:[#allocation17 + $0x48] sm:$0xff]  ;;  %v1937_v5 = vld [vmem:[%s3574_s6 + $0x18] sm:$0xff]  ;;  %v1936_v10 = vld [vmem:[%s3574_s6 + $0x10] sm:$0xff] }
 0x184   : > { %v1200_v13 = vmul.f32 %v1937_v5, %v3644_v56 }
 0x185   : > { %2361 = vmatpush3.bf16.msra.mxu0 %v3627_v36 }
 0x186   : > { %2393 = vmatpush3.bf16.msra.mxu1 %v2390_v37  ;;  %2363 = vmatprep.subr.bf16.mxu0 %v3631_v42 }
 0x187   : > { %2395 = vmatprep.subr.bf16.mxu1 %v2394_v43 }
 0x189   : > { %2365 = vmatpush3.bf16.msra.mxu0 %v3631_v42 }
 0x18a   : > { %2397 = vmatpush3.bf16.msra.mxu1 %v2394_v43  ;;  %2367 = vmatprep.subr.bf16.mxu0 %v3635_v48  ;;  %v605_v43 = vld [vmem:[#allocation8 + $0x8] sm:$0xff] }
 0x18b   : > { %2399 = vmatprep.subr.bf16.mxu1 %v2398_v49 }
 0x18d   : > { %2369 = vmatpush3.bf16.msra.mxu0 %v3635_v48 }
 0x18e   : > { %2401 = vmatpush3.bf16.msra.mxu1 %v2398_v49  ;;  %2403 = vmatprep.subr.bf16.mxu0 %v2402_v52  ;;  %v2490_v49 = vpack.c.bf16 %v661_v47, %v660_v46 }
 0x190   : > { %2119 = vmatmul.mubr.f32.vlgmr.msra.gmra.mrb[0].mxu0 %v3641_v55 }
 0x191   : > { %2154 = vmatmul.mubr.f32.vlgmr.msra.gmra.mrb[0].mxu1 %v3644_v56  ;;  %2405 = vmatpush3.bf16.msra.mxu0 %v2402_v52  ;;  %v2494_v52 = vpack.c.bf16 %v663_v51, %v662_v50 }
 0x192   : > { %2407 = vmatprep.subr.bf16.mxu0 %v2406_v57  ;;  %2188 = vmatprep.mubr.f32.mxu0 %v697_v58  ;;  %v666_v58 = vld [vmem:[#allocation17 + $0x30] sm:$0xff] }
 0x193   : > { %2216 = vmatprep.mubr.msk.f32.mxu1 %vm932_vm0, %v602_v17  ;;  %v2502_v60 = vpack.c.bf16 %v667_v59, %v666_v58 }
 0x195   : > { %2409 = vmatpush3.bf16.msra.mxu0 %v2406_v57  ;;  %v2498_v57 = vpack.c.bf16 %v665_v54, %v664_v53 }
 0x196   : > { %2411 = vmatprep.subr.bf16.mxu0 %v2410_v61 }
 0x199   : > { %2413 = vmatpush3.bf16.msra.mxu0 %v2410_v61  ;;  %v668_v61 = vld [vmem:[#allocation17 + $0x40] sm:$0xff] }
 0x19a   : > { %2415 = vmatprep.subr.bf16.mxu0 %v2414_v0  ;;  %v2506_v63 = vpack.c.bf16 %v669_v62, %v668_v61  ;;  %v608_v62 = vld [vmem:[%s3824_s28] sm:$0xff] }
 0x19d   : > { %2417 = vmatpush3.bf16.msra.mxu0 %v2414_v0 }
 0x19e   : > { %2419 = vmatprep.subr.bf16.mxu0 %v2418_v4 }
 0x1a1   : > { %2421 = vmatpush3.bf16.msra.mxu0 %v2418_v4  ;;  %v1183_v4 = vld [vmem:[%s3574_s6 + $0x8] sm:$0xff] }
 0x1a2   : > { %2423 = vmatprep.subr.bf16.mxu0 %v2422_v7  ;;  %v1198_v12 = vmul.f32 %v1183_v4, %v3641_v55 }
 0x1a5   : > { %2425 = vmatpush3.bf16.msra.mxu0 %v2422_v7 }
 0x1a6   : > { %2427 = vmatprep.subr.bf16.mxu0 %v2426_v11 }
 0x1a9   : > { %2429 = vmatpush3.bf16.msra.mxu0 %v2426_v11 }
 0x1aa   : > { %2431 = vmatprep.subr.bf16.mxu0 %v2430_v14 }
 0x1ad   : > { %2433 = vmatpush3.bf16.msra.mxu0 %v2430_v14  ;;  %v1212_v14 = vmul.f32 %v1937_v5, %v3641_v55 }
 0x1b0   : > { %2189 = vmatmul.mubr.f32.vlgmr.msra.gmra.mrb[2].mxu0 %v698_v15  ;;  %v1214_v15 = vmul.f32 %v3644_v56, %v1183_v4  ;;  %v677_v4 = vld [vmem:[#allocation19 + $0x8] sm:$0xff] }
 0x1b1   : > { %2195 = vmatprep.mubr.msk.f32.mxu0 %vm932_vm0, %v602_v17 }
 0x263   : > { %v2120_v18 = vpop.f32.mrb[0].mxu0 }
 0x264   : > { %v2155_v19 = vpop.f32.mrb[0].mxu1  ;;  %v765_v20 = vpop.f32.mrb[1].mxu0 }
 0x265   : > { %v925_v21 = vsub.f32 %v2120_v18, %v2155_v19  ;;  %v840_v23 = vpop.f32.mrb[1].mxu1 }
 0x266   : > { %v924_v24 = vsub.f32 %v765_v20, %v840_v23 }
 0x268   : > { %v2434_v25 = vpack.c.bf16 %v925_v21, %v924_v24 }
 0x26a   : > { %2435 = vmatprep.subr.bf16.mxu0 %v2434_v25 }
 0x26b   : > { %2437 = vmatpush3.bf16.msra.mxu0 %v2434_v25 }
 0x26e   : > { %2196 = vmatmul.mubr.msk.f32.vlgmr.msra.gmra.mrb[4].mxu0 %vm932_vm0, %v3654_v27 }
 0x26f   : > { %2202 = vmatprep.mubr.msk.f32.mxu0 %vm932_vm0, %v604_v28 }
 0x283   : > { %v2190_v31 = vpop.f32.mrb[2].mxu0 }
 0x284   : > { %v927_v32 = vsub.f32 %v2190_v31, %v2120_v18  ;;  %v915_v33 = vpop.f32.mrb[3].mxu0  ;;  %v1197_v18 = vmul.f32 %v1182_v9, %v3614_v26  ;;  %v1187_v31 = vsub.f32 1.0, %v3614_v26 }
 0x285   : > { %v926_v34 = vsub.f32 %v915_v33, %v765_v20  ;;  %v1211_v20 = vmul.f32 %v1936_v10, %v3614_v26 }
 0x286   : > { %v929_v35 = vsub.f32 %v927_v32, %v2155_v19  ;;  %v1199_v19 = vmul.f32 %v1936_v10, %v3618_v29  ;;  %v1189_v32 = vsub.f32 0.0, %v3618_v29  ;;  %v678_v10 = vld [vmem:[#allocation19 + $0x10] sm:$0xff] }
 0x287   : > { %v928_v37 = vsub.f32 %v926_v34, %v840_v23  ;;  %v1188_v23 = vsub.f32 1.0, %v3641_v55 }
 0x288   : > { %v931_v38 = vadd.f32 %v929_v35, %v925_v21  ;;  %v1213_v21 = vmul.f32 %v3618_v29, %v1182_v9 }
 0x289   : > { %v930_v39 = vadd.f32 %v928_v37, %v924_v24  ;;  %v2438_v40 = vpack.c.bf16 %v929_v35, %v928_v37  ;;  %v1190_v24 = vsub.f32 0.0, %v3644_v56  ;;  %v1202_v35 = vsub.f32 %v1198_v12, %v1200_v13 }
 0x28b   : > { %2439 = vmatprep.subr.bf16.mxu0 %v2438_v40  ;;  %v2442_v41 = vpack.c.bf16 %v931_v38, %v930_v39  ;;  %v1201_v38 = vsub.f32 %v1197_v18, %v1199_v19  ;;  %v1215_v39 = vadd.f32 %v1213_v21, %v1211_v20  ;;  %v680_v18 = vld [vmem:[#allocation19 + $0x20] sm:$0xff]  ;;  %v681_v19 = vld [vmem:[#allocation19 + $0x28] sm:$0xff] }
 0x28c   : > { %2441 = vmatpush3.bf16.msra.mxu0 %v2438_v40  ;;  %v1216_v40 = vadd.f32 %v1214_v15, %v1212_v14 }
 0x28d   : > { %2443 = vmatprep.subr.bf16.mxu0 %v2442_v41 }
 0x28f   : > { %2203 = vmatmul.mubr.msk.f32.vlgmr.msra.gmra.mrb[6].mxu0 %vm932_vm0, %v605_v43 }
 0x290   : > { %2445 = vmatpush3.bf16.msra.mxu0 %v2442_v41  ;;  %2209 = vmatprep.mubr.msk.f32.mxu0 %vm932_vm0, %v606_v44 }
 0x291   : > { %2491 = vmatprep.subr.bf16.mxu0 %v2490_v49 }
 0x293   : > { %2210 = vmatmul.mubr.msk.f32.vlgmr.msra.gmra.mrb[8].mxu0 %vm932_vm0, %v607_v45 }
 0x294   : > { %2493 = vmatpush3.bf16.msra.mxu0 %v2490_v49 }
 0x295   : > { %2495 = vmatprep.subr.bf16.mxu0 %v2494_v52 }
 0x298   : > { %2497 = vmatpush3.bf16.msra.mxu0 %v2494_v52 }
 0x299   : > { %2499 = vmatprep.subr.bf16.mxu0 %v2498_v57 }
 0x29c   : > { %2501 = vmatpush3.bf16.msra.mxu0 %v2498_v57 }
 0x29d   : > { %2503 = vmatprep.subr.bf16.mxu0 %v2502_v60 }
 0x2a0   : > { %2505 = vmatpush3.bf16.msra.mxu0 %v2502_v60 }
 0x2a1   : > { %2507 = vmatprep.subr.bf16.mxu0 %v2506_v63 }
 0x2a4   : > { %2509 = vmatpush3.bf16.msra.mxu0 %v2506_v63  ;;  %v609_v63 = vld [vmem:[%s3824_s28 + $0x8] sm:$0xff] }
 0x341   : > { %v2197_v0 = vpop.f32.mrb[4].mxu0 }
 0x342   : > { %v1005_v1 = vpop.f32.mrb[5].mxu0 }
 0x362   : > { %v2204_v2 = vpop.f32.mrb[6].mxu0 }
 0x363   : > { %v1177_v6 = vsub.f32 %v2197_v0, %v2204_v2  ;;  %v1086_v7 = vpop.f32.mrb[7].mxu0 }
 0x364   : > { %v1176_v11 = vsub.f32 %v1005_v1, %v1086_v7 }
 0x365   : > { %v1192_v41 = vmul.f32 %v1188_v23, %v1177_v6  ;;  %v1208_v43 = vmul.f32 %v1190_v24, %v1177_v6 }
 0x366   : > { %v2211_v17 = vpop.f32.mrb[8].mxu0  ;;  %v1191_v55 = vmul.f32 %v1187_v31, %v1176_v11  ;;  %v1207_v46 = vmul.f32 %v1189_v32, %v1176_v11  ;;  %v679_v11 = vld [vmem:[#allocation19 + $0x18] sm:$0xff] }
 0x367   : > { %v1179_v25 = vsub.f32 %v2211_v17, %v2197_v0  ;;  %v1167_v28 = vpop.f32.mrb[9].mxu0  ;;  %v610_v0 = vld [vmem:[#allocation11] sm:$0xff]  ;;  %v2526_v15 = vpack.c.bf16 %v679_v11, %v678_v10 }
 0x368   : > { %v1178_v33 = vsub.f32 %v1167_v28, %v1005_v1  ;;  %v611_v1 = vld [vmem:[#allocation11 + $0x8] sm:$0xff] }
 0x369   : > { %v1181_v34 = vsub.f32 %v1179_v25, %v2204_v2  ;;  %v676_v2 = vld [vmem:[#allocation19] sm:$0xff]  ;;  %v2530_v25 = vpack.c.bf16 %v681_v19, %v680_v18 }
 0x36a   : > { %v1180_v37 = vsub.f32 %v1178_v33, %v1086_v7  ;;  %v2522_v5 = vpack.c.bf16 %v677_v4, %v676_v2 }
 0x36b   : > { %v1194_v44 = vmul.f32 %v1190_v24, %v1181_v34  ;;  %v1206_v45 = vmul.f32 %v1188_v23, %v1181_v34 }
 0x36c   : > { %v1193_v56 = vmul.f32 %v1189_v32, %v1180_v37  ;;  %v1205_v47 = vmul.f32 %v1187_v31, %v1180_v37  ;;  %v682_v31 = vld [vmem:[#allocation19 + $0x30] sm:$0xff]  ;;  %v683_v32 = vld [vmem:[#allocation19 + $0x38] sm:$0xff]  ;;  %v684_v37 = vld [vmem:[#allocation19 + $0x40] sm:$0xff] }
 0x36d   : > { %v1196_v49 = vsub.f32 %v1192_v41, %v1194_v44  ;;  %v1210_v50 = vadd.f32 %v1208_v43, %v1206_v45  ;;  %v687_v41 = vld [vmem:[#allocation19 + $0x58] sm:$0xff]  ;;  %v688_v44 = vld [vmem:[#allocation19 + $0x60] sm:$0xff]  ;;  %v689_v45 = vld [vmem:[#allocation19 + $0x68] sm:$0xff] }
 0x36e   : > { %v1195_v26 = vsub.f32 %v1191_v55, %v1193_v56  ;;  %v1209_v51 = vadd.f32 %v1207_v46, %v1205_v47  ;;  %v2546_v55 = vpack.c.bf16 %v689_v45, %v688_v44  ;;  %v690_v46 = vld [vmem:[#allocation19 + $0x70] sm:$0xff]  ;;  %v691_v56 = vld [vmem:[#allocation19 + $0x78] sm:$0xff] }
 0x36f   : > { %v1204_v29 = vadd.f32 %v1202_v35, %v1196_v49  ;;  %v1218_v52 = vadd.f32 %v1216_v40, %v1210_v50  ;;  %v2534_v35 = vpack.c.bf16 %v683_v32, %v682_v31  ;;  %v686_v40 = vld [vmem:[#allocation19 + $0x50] sm:$0xff]  ;;  %v2550_v47 = vpack.c.bf16 %v691_v56, %v690_v46 }
 0x370   : > { %v1203_v53 = vadd.f32 %v1201_v38, %v1195_v26  ;;  %v1217_v54 = vadd.f32 %v1215_v39, %v1209_v51  ;;  %v685_v38 = vld [vmem:[#allocation19 + $0x48] sm:$0xff]  ;;  %v2542_v43 = vpack.c.bf16 %v687_v41, %v686_v40 }
 0x371   : > { %v1220_v57 = vadd.f32 %v1218_v52, %v1204_v29  ;;  %v2538_v39 = vpack.c.bf16 %v685_v38, %v684_v37 }
 0x372   : > { %v2446_v58 = vpack.c.bf16 %v1204_v29, %v1203_v53  ;;  %v2450_v59 = vpack.c.bf16 %v1218_v52, %v1217_v54  ;;  %v1219_v60 = vadd.f32 %v1217_v54, %v1203_v53 }
 0x374   : > { %2447 = vmatprep.subr.bf16.mxu1 %v2446_v58  ;;  %v2454_v61 = vpack.c.bf16 %v1220_v57, %v1219_v60 }
 0x375   : > { %2449 = vmatpush3.bf16.msra.mxu1 %v2446_v58 }
 0x376   : > { %2451 = vmatprep.subr.bf16.mxu1 %v2450_v59 }
 0x378   : > { %2217 = vmatmul.mubr.msk.f32.vlgmr.msra.gmra.mrb[2].mxu1 %vm932_vm0, %v3654_v27  ;;  %v673_v27 = vld [vmem:[#allocation17 + $0x68] sm:$0xff] }
 0x379   : > { %2453 = vmatpush3.bf16.msra.mxu1 %v2450_v59  ;;  %2223 = vmatprep.mubr.msk.f32.mxu1 %vm932_vm0, %v608_v62 }
 0x37a   : > { %2455 = vmatprep.subr.bf16.mxu1 %v2454_v61 }
 0x37c   : > { %2224 = vmatmul.mubr.msk.f32.vlgmr.msra.gmra.mrb[4].mxu1 %vm932_vm0, %v609_v63 }
 0x37d   : > { %2457 = vmatpush3.bf16.msra.mxu1 %v2454_v61  ;;  %2230 = vmatprep.mubr.msk.f32.mxu1 %vm932_vm0, %v610_v0 }
 0x37e   : > { %2459 = vmatprep.subr.bf16.mxu1 %v3600_v3 }
 0x380   : > { %2231 = vmatmul.mubr.msk.f32.vlgmr.msra.gmra.mrb[6].mxu1 %vm932_vm0, %v611_v1 }
 0x381   : > { %2461 = vmatpush3.bf16.msra.mxu1 %v3600_v3  ;;  %v670_v3 = vld [vmem:[#allocation17 + $0x50] sm:$0xff] }
 0x382   : > { %2463 = vmatprep.subr.bf16.mxu1 %v3602_v8 }
 0x385   : > { %2465 = vmatpush3.bf16.msra.mxu1 %v3602_v8  ;;  %v671_v8 = vld [vmem:[#allocation17 + $0x58] sm:$0xff] }
 0x386   : > { %2467 = vmatprep.subr.bf16.mxu1 %v3607_v16 }
 0x389   : > { %2469 = vmatpush3.bf16.msra.mxu1 %v3607_v16  ;;  %v2510_v16 = vpack.c.bf16 %v671_v8, %v670_v3 }
 0x38a   : > { %2471 = vmatprep.subr.bf16.mxu1 %v3611_v22 }
 0x38b   : > { %2511 = vmatprep.subr.bf16.mxu0 %v2510_v16 }
 0x38c   : > { %2513 = vmatpush3.bf16.msra.mxu0 %v2510_v16 }
 0x38d   : > { %2473 = vmatpush3.bf16.msra.mxu1 %v3611_v22  ;;  %v672_v22 = vld [vmem:[#allocation17 + $0x60] sm:$0xff] }
 0x38e   : > { %2475 = vmatprep.subr.bf16.mxu1 %v3623_v30 }
 0x391   : > { %2477 = vmatpush3.bf16.msra.mxu1 %v3623_v30  ;;  %v2514_v30 = vpack.c.bf16 %v673_v27, %v672_v22 }
 0x392   : > { %2479 = vmatprep.subr.bf16.mxu1 %v3627_v36 }
 0x393   : > { %2515 = vmatprep.subr.bf16.mxu0 %v2514_v30 }
 0x394   : > { %2517 = vmatpush3.bf16.msra.mxu0 %v2514_v30 }
 0x395   : > { %2481 = vmatpush3.bf16.msra.mxu1 %v3627_v36  ;;  %v674_v36 = vld [vmem:[#allocation17 + $0x70] sm:$0xff] }
 0x396   : > { %2483 = vmatprep.subr.bf16.mxu1 %v3631_v42 }
 0x399   : > { %2485 = vmatpush3.bf16.msra.mxu1 %v3631_v42  ;;  %v675_v42 = vld [vmem:[#allocation17 + $0x78] sm:$0xff] }
 0x39a   : > { %2487 = vmatprep.subr.bf16.mxu1 %v3635_v48  ;;  %v2518_v6 = vpack.c.bf16 %v675_v42, %v674_v36 }
 0x39c   : > { %2519 = vmatprep.subr.bf16.mxu0 %v2518_v6 }
 0x39d   : > { %2489 = vmatpush3.bf16.msra.mxu1 %v3635_v48  ;;  %2521 = vmatpush3.bf16.msra.mxu0 %v2518_v6 }
 0x39e   : > { %2523 = vmatprep.subr.bf16.mxu1 %v2522_v5 }
 0x44b   : > { %v2218_v48 = vpop.f32.mrb[2].mxu1 }
 0x44c   : > { %v1287_v7 = vpop.f32.mrb[3].mxu1 }
 0x44f   : > { %v2225_v9 = vpop.f32.mrb[4].mxu1 }
 0x450   : > { %v1459_v12 = vsub.f32 %v2218_v48, %v2225_v9  ;;  %v1368_v13 = vpop.f32.mrb[5].mxu1 }
 0x451   : > { %v1458_v14 = vsub.f32 %v1287_v7, %v1368_v13 }
 0x453   : > { %v2232_v17 = vpop.f32.mrb[6].mxu1  ;;  %2265 = vmatprep.mubr.f32.mxu1 %v1458_v14 }
 0x454   : > { %v1461_v20 = vsub.f32 %v2232_v17, %v2218_v48  ;;  %v1449_v21 = vpop.f32.mrb[7].mxu1  ;;  %2266 = vmatmul.mubr.f32.vlgmr.msra.gmra.mrb[8].mxu1 %v1459_v12 }
 0x455   : > { %v1460_v23 = vsub.f32 %v1449_v21, %v1287_v7  ;;  %2525 = vmatpush3.bf16.msra.mxu1 %v2522_v5 }
 0x456   : > { %v1463_v24 = vsub.f32 %v1461_v20, %v2225_v9  ;;  %2527 = vmatprep.subr.bf16.mxu1 %v2526_v15 }
 0x457   : > { %v1462_v28 = vsub.f32 %v1460_v23, %v1368_v13 }
 0x458   : > { %v1465_v33 = vadd.f32 %v1463_v24, %v1459_v12 }
 0x459   : > { %2529 = vmatpush3.bf16.msra.mxu1 %v2526_v15  ;;  %2300 = vmatprep.mubr.f32.mxu0 %v1462_v28  ;;  %v1464_v34 = vadd.f32 %v1462_v28, %v1458_v14 }
 0x45a   : > { %2301 = vmatmul.mubr.f32.vlgmr.msra.gmra.mrb[10].mxu0 %v1463_v24  ;;  %2531 = vmatprep.subr.bf16.mxu1 %v2530_v25 }
 0x45b   : > { %2335 = vmatprep.mubr.f32.mxu1 %v1464_v34 }
 0x45d   : > { %2533 = vmatpush3.bf16.msra.mxu1 %v2530_v25 }
 0x45e   : > { %2535 = vmatprep.subr.bf16.mxu1 %v2534_v35 }
 0x461   : > { %2537 = vmatpush3.bf16.msra.mxu1 %v2534_v35 }
 0x462   : > { %2539 = vmatprep.subr.bf16.mxu1 %v2538_v39 }
 0x465   : > { %2541 = vmatpush3.bf16.msra.mxu1 %v2538_v39 }
 0x466   : > { %2543 = vmatprep.subr.bf16.mxu1 %v2542_v43 }
 0x469   : > { %2545 = vmatpush3.bf16.msra.mxu1 %v2542_v43 }
 0x46a   : > { %2547 = vmatprep.subr.bf16.mxu1 %v2546_v55 }
 0x46d   : > { %2549 = vmatpush3.bf16.msra.mxu1 %v2546_v55 }
 0x46e   : > { %2551 = vmatprep.subr.bf16.mxu1 %v2550_v47 }
 0x471   : > { %2553 = vmatpush3.bf16.msra.mxu1 %v2550_v47 }
 0x474   : > { %2336 = vmatmul.mubr.f32.vlgmr.msra.gmra.mrb[10].mxu1 %v1465_v33 }
 0x527   : > { %v2267_v49 = vpop.f32.mrb[8].mxu1 }
 0x528   : > { %v1532_v50 = vpop.f32.mrb[9].mxu1 }
 0x52d   : > { %v2302_v26 = vpop.f32.mrb[10].mxu0 }
 0x52e   : > { %v1692_v51 = vsub.f32 %v2267_v49, %v2302_v26  ;;  %v1607_v29 = vpop.f32.mrb[11].mxu0 }
 0x52f   : > { %v1691_v52 = vsub.f32 %v1532_v50, %v1607_v29 }
 0x530   : > { %1698 = vst [vmem:[%s601_s14 + $0x8] sm:$0xff] %v1692_v51 }
 0x531   : > { %1697 = vst [vmem:[%s601_s14] sm:$0xff] %v1691_v52 }
 0x547   : > { %v2337_v53 = vpop.f32.mrb[10].mxu1 }
 0x548   : > { %v1694_v54 = vsub.f32 %v2337_v53, %v2267_v49  ;;  %v1682_v57 = vpop.f32.mrb[11].mxu1 }
 0x549   : > { %v1693_v58 = vsub.f32 %v1682_v57, %v1532_v50 }
 0x54a   : > { %v1696_v59 = vsub.f32 %v1694_v54, %v2302_v26 }
 0x54b   : > { %v1695_v60 = vsub.f32 %v1693_v58, %v1607_v29 }
 0x54c   : > { %1945 = vst [vmem:[%s601_s14 + $0x18] sm:$0xff] %v1696_v59 }
 0x54d   : > { %1944 = vst [vmem:[%s601_s14 + $0x10] sm:$0xff] %v1695_v60 }
 0x54e   : > { %3025 = shalt.err (!%p3022_p1)
}
 0x54f   : > { %s3026_s3 = scalar_lea.hbm %s3713_s9, 512  ;;  %s3030_s26 = scalar_lea.hbm %s3825_s0, 1024 }
 0x550   : > { %p3027_p13 = scmp.ne.s32.totalorder %s3713_s9, %s3026_s3  ;;  %p3031_p2 = scmp.lt.u32.totalorder %s3713_s9, %s3825_s0 }
 0x551   : > { %p3032_p6 = scmp.lt.u32.totalorder %s3030_s26, %s3026_s3  ;;  %p3034_p5 = scmp.lt.u32.totalorder %s3026_s3, %s3713_s9 }
 0x552   : > { %p3028_p0 = pnand %p3027_p13, %p3826_p9 }
 0x553   : > { %p3033_p10 = por %p3032_p6, %p3031_p2 }
 0x554   : > { %p3029_p7 = pneg %p3028_p0 }
 0x555   : > { %p3035_p4 = por %p3034_p5, %p3033_p10 }
 0x557   : > { %p3036_p8 = pnand %p3035_p4, %p3029_p7 }
 0x559   : > { %3039 = shalt.err (!%p3036_p8)
}
 0x55a   : > { %s3118_s14 = smov 128   ;;  %s3119_s30 = smov 8  }
 0x55b   : > { %2594 = dma.vmem_to_hbm [thread:$0]  (%p3826_p9), %s3708_s7, 512, %s3713_s9, %s1703_s8, %s3118_s14, %s3118_s14, %s3119_s30  }
 0x55c PF: > { %s1731_s2 = sand.u32 1, %s3090_s21   ;;  %p3827_p11 = scmp.ne.s32.totalorder %s3806_s16, 0 }
 0x55d   : > { %p3828_p3 = scmp.ge.s32.totalorder %s3102_s24, 2  ;;  %s1732_s13 = scalar_lea.sflag [#allocation4], %s1731_s2 }
 0x55f   : > { %p2632_p12 = pnand %p3828_p3, %p3827_p11 }
 0x561   : > { %3085 = dma.done.wait (!%p2632_p12), %s1732_s13, 512  }
 0x562   : > { %3087 = vsyncadd (!%p2632_p12), %s1732_s13, 4294966784  ;;  %p32_p1 = scmp.ge.s32.totalorder %s3442_s25, 4   ;;  %s3829_s21 = smov %s3094_s22 }
 0x563   : > { %s3830_s22 = smov %s3098_s23  ;;  %s3831_s23 = smov %s3454_s5 }
 0x564   : > { %s3832_s24 = smov %s3442_s25  ;;  %34 = sbr.rel (!%p32_p1) target bundleno = 23 (0x17), region = 165 }
 0x56b   :  { %1737 = vsyncpa [#allocation3], 1 }
 0x56c   :  { %1739 = vsyncpa [#allocation3 + $0x1], 1 }
 0x56d   :  { %1740 = vsyncpa [#allocation6], 1 }
 0x56e   :  { %1742 = vsyncpa [#allocation6 + $0x1], 1 }
 0x56f   :  { %1743 = vsyncpa [#allocation9], 1 }
 0x570   :  { %1744 = vsyncpa [#allocation12], 1 }
 0x571   :  { %1745 = vsyncpa [#allocation15], 1 }
 0x572   :  { %1746 = vsyncpa [#allocation18], 1 }
 0x573   :  { %1747 = vsyncpa [#allocation4], 1 }
 0x574   :  { %1749 = vsyncpa [#allocation4 + $0x1], 1 }

</bundles_post_ra>
